<compile_context>
chip_gen: v5e
topology: v5e:2x2
jax: 0.10.0
libtpu: 0.0.40
codegen_flags: <defaults>
</compile_context>

<pallas_src>
import functools

import jax
import jax.numpy as jnp
from jax.experimental import pallas as pl
from jax.experimental.pallas import tpu as pltpu

HIDDEN = 256
LANE = 128
MAX_TILE_B = 2048   # keeps per-tile temporaries < ~7 MiB (fits v5e's 16 MiB default)


def _round_up(x, m):
    return ((x + m - 1) // m) * m


def _choose_tiling(batch, tile_b):
    """Lane-granular batch tile + tile count (>=2 tiles when batch >= 256)."""
    tile_b = max(LANE, min(_round_up(tile_b, LANE), MAX_TILE_B))
    # >= 2 grid steps when the batch can fill two full-lane tiles, so v7x's
    # two TensorCores each get work; single step otherwise (tiny batches).
    min_tiles = 2 if batch >= 2 * LANE else 1
    num_tiles = max(pl.cdiv(batch, tile_b), min_tiles)
    tb = _round_up(pl.cdiv(batch, num_tiles), LANE)   # tight: caps padding waste
    num_tiles = max(pl.cdiv(batch, tb), min_tiles)
    return tb, num_tiles


def _critic_kernel(x_ref, w1_ref, b1_ref, w2_ref, b2_ref, w3_ref, b3_ref,
                   o_ref, *, epilogue_dtype):
    """One batch tile, feature-major.

    x_ref : (F, tb) f32        -- cat(state, action), transposed
    w1    : (256, F)  bf16     -- PyTorch (out, in) layout
    w2    : (256, 256) bf16
    w3    : (1, 256)  bf16
    b1,b2 : (256, 1)  f32 columns (lane-broadcast)
    b3    : (1, 1)    f32 in SMEM (scalar)
    o_ref : (1, 1, tb) f32     -- lane-dense q row for this tile
    """
    x = x_ref[...].astype(jnp.bfloat16)

    # fc1 + bias + ReLU (epilogue in bf16 on v6e/v7x, f32 on older chips).
    h = jnp.dot(w1_ref[...], x, preferred_element_type=jnp.float32)
    h = jnp.maximum(h.astype(epilogue_dtype) + b1_ref[...].astype(epilogue_dtype), 0)

    # fc2 + bias + ReLU.
    h = jnp.dot(w2_ref[...], h.astype(jnp.bfloat16),
                preferred_element_type=jnp.float32)
    h = jnp.maximum(h.astype(epilogue_dtype) + b2_ref[...].astype(epilogue_dtype), 0)

    # fc3: (1,256) @ (256,tb) on the MXU (it has huge slack) -> lane-dense row.
    q = jnp.dot(w3_ref[...], h.astype(jnp.bfloat16),
                preferred_element_type=jnp.float32)
    o_ref[0] = q + b3_ref[0, 0]


@functools.partial(jax.jit, static_argnames=("tile_b", "epilogue"))
def critic_forward(state, action, params, tile_b=1024, epilogue="auto"):
    """CriticNetwork.forward: fc3(relu(fc2(relu(fc1(cat(state, action))))))."""
    w1, b1, w2, b2, w3, b3 = params
    B = state.shape[0]
    F = state.shape[1] + action.shape[1]

    if epilogue == "auto":
        kind = jax.devices()[0].device_kind.lower()
        epilogue = "f32" if any(g in kind for g in ("v2", "v3", "v4", "v5")) else "bf16"
    epi_dtype = jnp.float32 if epilogue == "f32" else jnp.bfloat16

    tb, num_tiles = _choose_tiling(B, tile_b)
    b_pad = tb * num_tiles

    # Fuse torch.cat and go feature-major (batch on lanes). Wrapper-side
    # transpose/pad is cheap layout plumbing (~48 B/row of HBM).
    x = jnp.concatenate([state, action], axis=-1).astype(jnp.float32)
    x = jnp.pad(x, ((0, b_pad - B), (0, 0))).T            # (F, b_pad)

    const = lambda shape: pl.BlockSpec(shape, lambda i: (0, 0))

    flops = 2 * b_pad * (F * HIDDEN + HIDDEN * HIDDEN + HIDDEN)
    bytes_accessed = (b_pad * (F + 1) * 4                       # x in, q out
                      + (w1.size + w2.size + w3.size) * 2       # bf16 weights
                      + (b1.size + b2.size + b3.size) * 4)      # f32 biases

    q_rows = pl.pallas_call(
        functools.partial(_critic_kernel, epilogue_dtype=epi_dtype),
        out_shape=jax.ShapeDtypeStruct((num_tiles, 1, tb), jnp.float32),
        grid=(num_tiles,),
        in_specs=[
            pl.BlockSpec((F, tb), lambda i: (0, i)),            # streamed activations
            const(w1.shape), const(b1.shape),                   # VMEM-resident weights
            const(w2.shape), const(b2.shape),
            const(w3.shape),
            pl.BlockSpec(memory_space=pltpu.MemorySpace.SMEM),  # b3 scalar in SMEM
        ],
        out_specs=pl.BlockSpec((1, 1, tb), lambda i: (i, 0, 0)),  # lane-dense rows
        compiler_params=pltpu.CompilerParams(
            dimension_semantics=("parallel",)),                 # 2 TCs on v7x
        cost_estimate=pl.CostEstimate(
            flops=flops, transcendentals=0, bytes_accessed=bytes_accessed),
    )(x, w1, b1, w2, b2, w3, b3)

    return q_rows.reshape(b_pad, 1)[:B]


def init_critic_params(key, state_dim, action_dim, hidden=HIDDEN):
    """nn.Linear-style init (uniform +/- 1/sqrt(fan_in)), PyTorch (out, in) layout.

    Matmul weights stored bf16 (native MXU dtype, half the HBM/VMEM traffic);
    biases stored f32 as (out, 1) columns; b3 is a (1, 1) scalar.
    """
    def linear(key, fan_in, fan_out):
        kw, kb = jax.random.split(key)
        bound = 1.0 / jnp.sqrt(float(fan_in))
        w = jax.random.uniform(kw, (fan_out, fan_in), jnp.float32, -bound, bound)
        b = jax.random.uniform(kb, (fan_out, 1), jnp.float32, -bound, bound)
        return w, b

    k1, k2, k3 = jax.random.split(key, 3)
    w1, b1 = linear(k1, state_dim + action_dim, hidden)
    w2, b2 = linear(k2, hidden, hidden)
    w3, b3 = linear(k3, hidden, 1)
    return (w1.astype(jnp.bfloat16), b1,
            w2.astype(jnp.bfloat16), b2,
            w3.astype(jnp.bfloat16), b3)


def critic_reference(state, action, params, epilogue="bf16"):
    """Pure-JAX reference using the identical precision recipe."""
    w1, b1, w2, b2, w3, b3 = params
    epi = jnp.float32 if epilogue == "f32" else jnp.bfloat16
    x = jnp.concatenate([state, action], axis=-1).astype(jnp.bfloat16)
    h = jnp.dot(x, w1.T, preferred_element_type=jnp.float32)
    h = jnp.maximum(h.astype(epi) + b1.T.astype(epi), 0)
    h = jnp.dot(h.astype(jnp.bfloat16), w2.T, preferred_element_type=jnp.float32)
    h = jnp.maximum(h.astype(epi) + b2.T.astype(epi), 0)
    q = jnp.dot(h.astype(jnp.bfloat16), w3.T, preferred_element_type=jnp.float32)
    return q + b3[0, 0]


if __name__ == "__main__":
    key = jax.random.PRNGKey(0)
    k_params, k_state, k_action = jax.random.split(key, 3)

    batch, state_dim, action_dim = 8, 8, 4
    params = init_critic_params(k_params, state_dim, action_dim)

    state = jax.random.normal(k_state, (batch, state_dim), jnp.float32)
    action = jax.random.normal(k_action, (batch, action_dim), jnp.float32)

    kind = jax.devices()[0].device_kind.lower()
    epilogue = "f32" if any(g in kind for g in ("v2", "v3", "v4", "v5")) else "bf16"

    q = critic_forward(state, action, params, epilogue=epilogue)
    q = jax.block_until_ready(q)

    q_ref = critic_reference(state, action, params, epilogue=epilogue)
    assert q.shape == (batch, 1), q.shape
    assert jnp.allclose(q, q_ref, atol=5e-3, rtol=5e-3), "mismatch vs reference"
    print("KERNEL_OK")
</pallas_src>

<mosaic_0001>
module attributes {stable_mosaic.version = 11 : i64} {
  func.func @_critic_kernel(%arg0: i32, %arg1: memref<12x128xf32, #tpu.memory_space<vmem>>, %arg2: memref<256x12xbf16, #tpu.memory_space<vmem>>, %arg3: memref<256x1xf32, #tpu.memory_space<vmem>>, %arg4: memref<256x256xbf16, #tpu.memory_space<vmem>>, %arg5: memref<256x1xf32, #tpu.memory_space<vmem>>, %arg6: memref<1x256xbf16, #tpu.memory_space<vmem>>, %arg7: memref<1x1xf32, #tpu.memory_space<smem>>, %arg8: memref<1x1x128xf32, #tpu.memory_space<vmem>>) attributes {dimension_semantics = [#tpu.dimension_semantics<parallel>], iteration_bounds = array<i64: 1>, scalar_prefetch = 0 : i64, scratch_operands = 0 : i64, tpu.core_type = #tpu.core_type<tc>, window_params = [{transform_indices = @transform_0, window_bounds = array<i64: 12, 128>}, {pipeline_mode = #tpu.pipeline_mode<synchronous>, transform_indices = @transform_1, window_bounds = array<i64: 256, 12>}, {pipeline_mode = #tpu.pipeline_mode<synchronous>, transform_indices = @transform_2, window_bounds = array<i64: 256, 1>}, {pipeline_mode = #tpu.pipeline_mode<synchronous>, transform_indices = @transform_3, window_bounds = array<i64: 256, 256>}, {pipeline_mode = #tpu.pipeline_mode<synchronous>, transform_indices = @transform_4, window_bounds = array<i64: 256, 1>}, {pipeline_mode = #tpu.pipeline_mode<synchronous>, transform_indices = @transform_5, window_bounds = array<i64: 1, 256>}, {transform_indices = @transform_6, window_bounds = array<i64: 1, 1>}, {transform_indices = @transform_7, window_bounds = array<i64: 1, 1, 128>}]} {
    %c0 = arith.constant 0 : index
    %c0_0 = arith.constant 0 : index
    %0 = vector.load %arg1[%c0, %c0_0] : memref<12x128xf32, #tpu.memory_space<vmem>>, vector<12x128xf32>
    %1 = arith.truncf %0 : vector<12x128xf32> to vector<12x128xbf16>
    %c0_1 = arith.constant 0 : index
    %c0_2 = arith.constant 0 : index
    %2 = vector.load %arg2[%c0_1, %c0_2] : memref<256x12xbf16, #tpu.memory_space<vmem>>, vector<256x12xbf16>
    %cst = arith.constant dense<0.000000e+00> : vector<256x128xf32>
    %3 = tpu.matmul %2, %1, %cst {dimension_numbers = #tpu.dot_dimension_numbers<[1], [0], [0], [1], [0, 0, 1, 1], [], []>} : vector<256x12xbf16>, vector<12x128xbf16>, vector<256x128xf32> -> vector<256x128xf32>
    %4 = arith.truncf %3 : vector<256x128xf32> to vector<256x128xbf16>
    %c0_3 = arith.constant 0 : index
    %c0_4 = arith.constant 0 : index
    %5 = vector.load %arg3[%c0_3, %c0_4] : memref<256x1xf32, #tpu.memory_space<vmem>>, vector<256x1xf32>
    %6 = arith.truncf %5 : vector<256x1xf32> to vector<256x1xbf16>
    %7 = vector.broadcast %6 : vector<256x1xbf16> to vector<256x128xbf16>
    %8 = arith.addf %4, %7 : vector<256x128xbf16>
    %cst_5 = arith.constant 0.000000e+00 : bf16
    %9 = vector.broadcast %cst_5 : bf16 to vector<256x128xbf16>
    %10 = arith.maximumf %8, %9 : vector<256x128xbf16>
    %c0_6 = arith.constant 0 : index
    %c0_7 = arith.constant 0 : index
    %11 = vector.load %arg4[%c0_6, %c0_7] : memref<256x256xbf16, #tpu.memory_space<vmem>>, vector<256x256xbf16>
    %cst_8 = arith.constant dense<0.000000e+00> : vector<256x128xf32>
    %12 = tpu.matmul %11, %10, %cst_8 {dimension_numbers = #tpu.dot_dimension_numbers<[1], [0], [0], [1], [0, 0, 1, 1], [], []>} : vector<256x256xbf16>, vector<256x128xbf16>, vector<256x128xf32> -> vector<256x128xf32>
    %13 = arith.truncf %12 : vector<256x128xf32> to vector<256x128xbf16>
    %c0_9 = arith.constant 0 : index
    %c0_10 = arith.constant 0 : index
    %14 = vector.load %arg5[%c0_9, %c0_10] : memref<256x1xf32, #tpu.memory_space<vmem>>, vector<256x1xf32>
    %15 = arith.truncf %14 : vector<256x1xf32> to vector<256x1xbf16>
    %16 = vector.broadcast %15 : vector<256x1xbf16> to vector<256x128xbf16>
    %17 = arith.addf %13, %16 : vector<256x128xbf16>
    %cst_11 = arith.constant 0.000000e+00 : bf16
    %18 = vector.broadcast %cst_11 : bf16 to vector<256x128xbf16>
    %19 = arith.maximumf %17, %18 : vector<256x128xbf16>
    %c0_12 = arith.constant 0 : index
    %c0_13 = arith.constant 0 : index
    %20 = vector.load %arg6[%c0_12, %c0_13] : memref<1x256xbf16, #tpu.memory_space<vmem>>, vector<1x256xbf16>
    %cst_14 = arith.constant dense<0.000000e+00> : vector<1x128xf32>
    %21 = tpu.matmul %20, %19, %cst_14 {dimension_numbers = #tpu.dot_dimension_numbers<[1], [0], [0], [1], [0, 0, 1, 1], [], []>} : vector<1x256xbf16>, vector<256x128xbf16>, vector<1x128xf32> -> vector<1x128xf32>
    %c0_15 = arith.constant 0 : index
    %c0_16 = arith.constant 0 : index
    %22 = memref.load %arg7[%c0_15, %c0_16] : memref<1x1xf32, #tpu.memory_space<smem>>
    %23 = vector.broadcast %22 : f32 to vector<1x128xf32>
    %24 = arith.addf %21, %23 : vector<1x128xf32>
    %c0_17 = arith.constant 0 : index
    %c0_18 = arith.constant 0 : index
    %c0_19 = arith.constant 0 : index
    %25 = vector.load %arg8[%c0_17, %c0_18, %c0_19] : memref<1x1x128xf32, #tpu.memory_space<vmem>>, vector<1x1x128xf32>
    %26 = vector.shape_cast %25 : vector<1x1x128xf32> to vector<1x128xf32>
    %27 = vector.shape_cast %24 : vector<1x128xf32> to vector<1x1x128xf32>
    tpu.vector_store %arg8[%c0_17, %c0_18, %c0_19], %27 {strides = array<i32>} : memref<1x1x128xf32, #tpu.memory_space<vmem>>, vector<1x1x128xf32>,
    return
  }
  func.func @transform_0(%arg0: i32) -> (i32, i32) {
    %c0_i32 = arith.constant 0 : i32
    %c0_i32_0 = arith.constant 0 : i32
    return %c0_i32, %arg0 : i32, i32
  }
  func.func @transform_1(%arg0: i32) -> (i32, i32) {
    %c0_i32 = arith.constant 0 : i32
    %c0_i32_0 = arith.constant 0 : i32
    %c0_i32_1 = arith.constant 0 : i32
    return %c0_i32, %c0_i32_0 : i32, i32
  }
  func.func @transform_2(%arg0: i32) -> (i32, i32) {
    %c0_i32 = arith.constant 0 : i32
    %c0_i32_0 = arith.constant 0 : i32
    %c0_i32_1 = arith.constant 0 : i32
    return %c0_i32, %c0_i32_0 : i32, i32
  }
  func.func @transform_3(%arg0: i32) -> (i32, i32) {
    %c0_i32 = arith.constant 0 : i32
    %c0_i32_0 = arith.constant 0 : i32
    %c0_i32_1 = arith.constant 0 : i32
    return %c0_i32, %c0_i32_0 : i32, i32
  }
  func.func @transform_4(%arg0: i32) -> (i32, i32) {
    %c0_i32 = arith.constant 0 : i32
    %c0_i32_0 = arith.constant 0 : i32
    %c0_i32_1 = arith.constant 0 : i32
    return %c0_i32, %c0_i32_0 : i32, i32
  }
  func.func @transform_5(%arg0: i32) -> (i32, i32) {
    %c0_i32 = arith.constant 0 : i32
    %c0_i32_0 = arith.constant 0 : i32
    %c0_i32_1 = arith.constant 0 : i32
    return %c0_i32, %c0_i32_0 : i32, i32
  }
  func.func @transform_6(%arg0: i32) -> (i32, i32) {
    %c0_i32 = arith.constant 0 : i32
    %c0_i32_0 = arith.constant 0 : i32
    %c0_i32_1 = arith.constant 0 : i32
    return %c0_i32, %c0_i32_0 : i32, i32
  }
  func.func @transform_7(%arg0: i32) -> (i32, i32, i32) {
    %c0_i32 = arith.constant 0 : i32
    %c0_i32_0 = arith.constant 0 : i32
    %c0_i32_1 = arith.constant 0 : i32
    return %arg0, %c0_i32, %c0_i32_0 : i32, i32, i32
  }
}

</mosaic_0001>

<bundles_post_ra>
// kernel: critic_forward.1
= control target key start
LH: loop header
LB: loop body
LE: loop exit
PB: predicated region body
PF: predicated region fallthrough
CT: control target
= control target key end

     0   :  { %v2157_v0 = vmov 0   ;;  %vm192_vm0 = vcmask 1045504   ;;  %vm143_vm1 = vcmask 97280   ;;  %s2996_s2 = inlined_call_operand.vmem [shape: f32[256,1], index: 2, kind: input, shape index: {}]   ;;  %s2997_s0 = inlined_call_operand.vmem [shape: f32[12,128], index: 0, kind: input, shape index: {}]   ;;  %s2998_s1 = inlined_call_operand.vmem [shape: bf16[256,12], index: 1, kind: input, shape index: {}]   ;;  %s2999_s4 = inlined_call_operand.vmem [shape: f32[256,1], index: 4, kind: input, shape index: {}]   ;;  %s3000_s3 = inlined_call_operand.vmem [shape: bf16[256,256], index: 3, kind: input, shape index: {}]   ;;  %s3001_s5 = inlined_call_operand.vmem [shape: bf16[1,256], index: 5, kind: input, shape index: {}]   ;;  %s3002_s6 = inlined_call_operand.<no memory space> [shape: f32[1,1], index: 6, kind: input, shape index: {}]   ;;  %s3003_s7 = inlined_call_operand.vmem [shape: f32[1,1,128], index: 7, kind: output, shape index: {}]  }
   0x1   :  { %2156 = vset.pattern.permute.xlu2 %v2157_v0  ;;  %2155 = vset.pattern.permute.xlu1 %v2157_v0  ;;  %v347_v1 = vld [vmem:[%s2996_s2 + $0xf0] sm:$0xff]  ;;  %v345_v2 = vld [vmem:[%s2996_s2 + $0xe0] sm:$0xff]  ;;  %v29_v8 = vld [vmem:[%s2997_s0 + $0x8] sm:$0xf] }
   0x2   :  { %v331_v3 = vld [vmem:[%s2996_s2 + $0x70] sm:$0xff]  ;;  %2154 = vset.pattern.permute.xlu0 %v2157_v0  ;;  %v379_v4 = vpack.c.bf16 %v347_v1, %v347_v1  ;;  %v377_v5 = vpack.c.bf16 %v345_v2, %v345_v2  ;;  %v28_v7 = vld [vmem:[%s2997_s0] sm:$0xff]  ;;  %v348_v12 = vld [vmem:[%s2996_s2 + $0xf8] sm:$0xff] }
   0x3   :  { %v363_v6 = vpack.c.bf16 %v331_v3, %v331_v3  ;;  %v30_v9 = vpack.c.bf16 %v29_v8, %v28_v7  ;;  %v2087_v11 = vld [vmem:[%s2998_s1] sm:$0xff]  ;;  %v346_v13 = vld [vmem:[%s2996_s2 + $0xe8] sm:$0xff]  ;;  %v332_v14 = vld [vmem:[%s2996_s2 + $0x78] sm:$0xff]  ;;  %v380_v15 = vpack.c.bf16 %v348_v12, %v348_v12 }
   0x4   :  { %653 = vperm.xlu0 %2154, %v379_v4   ;;  %635 = vperm.xlu1 %2155, %v377_v5   ;;  %v378_v16 = vpack.c.bf16 %v346_v13, %v346_v13  ;;  %v364_v17 = vpack.c.bf16 %v332_v14, %v332_v14  ;;  %v344_v18 = vld [vmem:[%s2996_s2 + $0xd8] sm:$0xff]  ;;  %v343_v19 = vld [vmem:[%s2996_s2 + $0xd0] sm:$0xff]  ;;  %v329_v20 = vld [vmem:[%s2996_s2 + $0x60] sm:$0xff] }
   0x5   :  { %509 = vperm.xlu2 %2156, %v363_v6   ;;  %v194_v10 = vsel %vm192_vm0, %v30_v9, 0  ;;  %v376_v21 = vpack.c.bf16 %v344_v18, %v344_v18  ;;  %v375_v22 = vpack.c.bf16 %v343_v19, %v343_v19  ;;  %v361_v23 = vpack.c.bf16 %v329_v20, %v329_v20  ;;  %v2088_v24 = vld [vmem:[%s2998_s1 + $0x8] sm:$0xff]  ;;  %v341_v25 = vld [vmem:[%s2996_s2 + $0xc0] sm:$0xff]  ;;  %v328_v31 = vld [vmem:[%s2996_s2 + $0x58] sm:$0xff] }
   0x6   :  { %203 = vmatpush.bf16.msra.mxu0 %v194_v10  ;;  %2135 = vmatpush.bf16.msra.mxu3 %v194_v10  ;;  %v330_v26 = vld [vmem:[%s2996_s2 + $0x68] sm:$0xff]  ;;  %v373_v28 = vpack.c.bf16 %v341_v25, %v341_v25  ;;  %v327_v32 = vld [vmem:[%s2996_s2 + $0x50] sm:$0xff]  ;;  %v360_v34 = vpack.c.bf16 %v328_v31, %v328_v31  ;;  %v340_v38 = vld [vmem:[%s2996_s2 + $0xb8] sm:$0xff] }
   0x7   :  { %v342_v27 = vld [vmem:[%s2996_s2 + $0xc8] sm:$0xff]  ;;  %v362_v29 = vpack.c.bf16 %v330_v26, %v330_v26  ;;  %v339_v33 = vld [vmem:[%s2996_s2 + $0xb0] sm:$0xff]  ;;  %v359_v35 = vpack.c.bf16 %v327_v32, %v327_v32  ;;  %v325_v39 = vld [vmem:[%s2996_s2 + $0x40] sm:$0xff]  ;;  %v372_v41 = vpack.c.bf16 %v340_v38, %v340_v38 }
   0x8   :  { %v374_v30 = vpack.c.bf16 %v342_v27, %v342_v27  ;;  %v371_v36 = vpack.c.bf16 %v339_v33, %v339_v33  ;;  %v2089_v37 = vld [vmem:[%s2998_s1 + $0x10] sm:$0xff]  ;;  %v326_v40 = vld [vmem:[%s2996_s2 + $0x48] sm:$0xff]  ;;  %v357_v42 = vpack.c.bf16 %v325_v39, %v325_v39  ;;  %v337_v44 = vld [vmem:[%s2996_s2 + $0xa0] sm:$0xff] }
   0x9   :  { %1943 = vmatmul.msk.bf16.vlgmr.msra.gmra.mxu0 %vm143_vm1, %v2087_v11  ;;  %v358_v43 = vpack.c.bf16 %v326_v40, %v326_v40  ;;  %v338_v45 = vld [vmem:[%s2996_s2 + $0xa8] sm:$0xff]  ;;  %v323_v46 = vld [vmem:[%s2996_s2 + $0x30] sm:$0xff]  ;;  %v369_v47 = vpack.c.bf16 %v337_v44, %v337_v44  ;;  %v2090_v50 = vld [vmem:[%s2998_s1 + $0x18] sm:$0xff] }
   0xa   :  { %v370_v48 = vpack.c.bf16 %v338_v45, %v338_v45  ;;  %v355_v49 = vpack.c.bf16 %v323_v46, %v323_v46  ;;  %v335_v51 = vld [vmem:[%s2996_s2 + $0x90] sm:$0xff]  ;;  %v324_v52 = vld [vmem:[%s2996_s2 + $0x38] sm:$0xff]  ;;  %v322_v57 = vld [vmem:[%s2996_s2 + $0x28] sm:$0xff] }
   0xb   :  { %v336_v53 = vld [vmem:[%s2996_s2 + $0x98] sm:$0xff]  ;;  %v367_v54 = vpack.c.bf16 %v335_v51, %v335_v51  ;;  %v356_v55 = vpack.c.bf16 %v324_v52, %v324_v52  ;;  %v321_v58 = vld [vmem:[%s2996_s2 + $0x20] sm:$0xff]  ;;  %v354_v60 = vpack.c.bf16 %v322_v57, %v322_v57  ;;  %v334_v0 = vld [vmem:[%s2996_s2 + $0x88] sm:$0xff] }
   0xc   :  { %662 = vperm.xlu0 %2154, %v380_v15   ;;  %644 = vperm.xlu1 %2155, %v378_v16   ;;  %v368_v56 = vpack.c.bf16 %v336_v53, %v336_v53  ;;  %v333_v59 = vld [vmem:[%s2996_s2 + $0x80] sm:$0xff]  ;;  %v353_v61 = vpack.c.bf16 %v321_v58, %v321_v58  ;;  %v319_v1 = vld [vmem:[%s2996_s2 + $0x10] sm:$0xff]  ;;  %v320_v2 = vld [vmem:[%s2996_s2 + $0x18] sm:$0xff]  ;;  %v366_v3 = vpack.c.bf16 %v334_v0, %v334_v0 }
   0xd   :  { %518 = vperm.xlu2 %2156, %v364_v17   ;;  %v365_v62 = vpack.c.bf16 %v333_v59, %v333_v59  ;;  %v2091_v63 = vld [vmem:[%s2998_s1 + $0x20] sm:$0xff]  ;;  %v351_v4 = vpack.c.bf16 %v319_v1, %v319_v1  ;;  %v352_v5 = vpack.c.bf16 %v320_v2, %v320_v2  ;;  %v318_v6 = vld [vmem:[%s2996_s2 + $0x8] sm:$0xff]  ;;  %v1294_v11 = vld [vmem:[%s2999_s4 + $0x78] sm:$0xff] }
   0xe   :  { %v317_v7 = vld [vmem:[%s2996_s2] sm:$0xff]  ;;  %v350_v8 = vpack.c.bf16 %v318_v6, %v318_v6  ;;  %v2092_v10 = vld [vmem:[%s2998_s1 + $0x28] sm:$0xff]  ;;  %v1326_v13 = vpack.c.bf16 %v1294_v11, %v1294_v11  ;;  %v1289_v15 = vld [vmem:[%s2999_s4 + $0x50] sm:$0xff] }
   0xf   :  { %v349_v9 = vpack.c.bf16 %v317_v7, %v317_v7  ;;  %v1291_v12 = vld [vmem:[%s2999_s4 + $0x60] sm:$0xff]  ;;  %v1290_v16 = vld [vmem:[%s2999_s4 + $0x58] sm:$0xff]  ;;  %v1293_v18 = vld [vmem:[%s2999_s4 + $0x70] sm:$0xff]  ;;  %v1321_v19 = vpack.c.bf16 %v1289_v15, %v1289_v15 }
  0x10   :  { %v1323_v14 = vpack.c.bf16 %v1291_v12, %v1291_v12  ;;  %v1322_v20 = vpack.c.bf16 %v1290_v16, %v1290_v16  ;;  %v2101_v26 = vld [vmem:[%s2998_s1 + $0x70] sm:$0xff]  ;;  %v1292_v27 = vld [vmem:[%s2999_s4 + $0x68] sm:$0xff]  ;;  %v1310_v32 = vld [vmem:[%s2999_s4 + $0xf8] sm:$0xff] }
  0x11   :  { %1957 = vmatmul.msk.bf16.vlgmr.msra.gmra.mxu3 %vm143_vm1, %v2101_v26  ;;  %v1309_v31 = vld [vmem:[%s2999_s4 + $0xf0] sm:$0xff]  ;;  %v1287_v33 = vld [vmem:[%s2999_s4 + $0x40] sm:$0xff]  ;;  %v2094_v38 = vld [vmem:[%s2998_s1 + $0x38] sm:$0xff] }
  0x12   :  { %v1284_v39 = vld [vmem:[%s2999_s4 + $0x28] sm:$0xff]  ;;  %v1307_v40 = vld [vmem:[%s2999_s4 + $0xe0] sm:$0xff]  ;;  %v1286_v44 = vld [vmem:[%s2999_s4 + $0x38] sm:$0xff] }
  0x13   :  { %v1316_v45 = vpack.c.bf16 %v1284_v39, %v1284_v39  ;;  %v1339_v46 = vpack.c.bf16 %v1307_v40, %v1307_v40  ;;  %v1283_v53 = vld [vmem:[%s2999_s4 + $0x20] sm:$0xff]  ;;  %v1306_v59 = vld [vmem:[%s2999_s4 + $0xd8] sm:$0xff]  ;;  %v1308_v0 = vld [vmem:[%s2999_s4 + $0xe8] sm:$0xff] }
  0x14   :  { %626 = vperm.xlu1 %2155, %v376_v21   ;;  %617 = vperm.xlu0 %2154, %v375_v22   ;;  %v1325_v21 = vpack.c.bf16 %v1293_v18, %v1293_v18  ;;  %v2093_v22 = vld [vmem:[%s2998_s1 + $0x30] sm:$0xff]  ;;  %v2095_v58 = vld [vmem:[%s2998_s1 + $0x40] sm:$0xff]  ;;  %v1338_v1 = vpack.c.bf16 %v1306_v59, %v1306_v59  ;;  %v1302_v15 = vld [vmem:[%s2999_s4 + $0xb8] sm:$0xff] }
  0x15   :  { %491 = vperm.xlu2 %2156, %v361_v23   ;;  %v1288_v23 = vld [vmem:[%s2999_s4 + $0x48] sm:$0xff]  ;;  %v1299_v16 = vld [vmem:[%s2999_s4 + $0xa0] sm:$0xff] }
  0x16   :  { %v1296_v39 = vld [vmem:[%s2999_s4 + $0x88] sm:$0xff] }
  0x19   :  { %1944 = vmatmul.msk.bf16.gmra.mxu0 %vm143_vm1, %v2088_v24  ;;  %v1285_v24 = vld [vmem:[%s2999_s4 + $0x30] sm:$0xff] }
  0x1c   :  { %599 = vperm.xlu1 %2155, %v373_v28   ;;  %500 = vperm.xlu0 %2154, %v362_v29   ;;  %v1320_v28 = vpack.c.bf16 %v1288_v23, %v1288_v23  ;;  %v1317_v29 = vpack.c.bf16 %v1285_v24, %v1285_v24  ;;  %v1331_v23 = vpack.c.bf16 %v1299_v16, %v1299_v16 }
  0x1d   :  { %608 = vperm.xlu2 %2156, %v374_v30   ;;  %v1324_v30 = vpack.c.bf16 %v1292_v27, %v1292_v27  ;;  %v1297_v27 = vld [vmem:[%s2999_s4 + $0x90] sm:$0xff] }
  0x24   :  { %482 = vperm.xlu1 %2155, %v360_v34   ;;  %473 = vperm.xlu0 %2154, %v359_v35   ;;  %v1341_v34 = vpack.c.bf16 %v1309_v31, %v1309_v31  ;;  %v1342_v35 = vpack.c.bf16 %v1310_v32, %v1310_v32  ;;  %v1301_v32 = vld [vmem:[%s2999_s4 + $0xb0] sm:$0xff] }
  0x25   :  { %581 = vperm.xlu2 %2156, %v371_v36   ;;  %v1319_v36 = vpack.c.bf16 %v1287_v33, %v1287_v33  ;;  %v1329_v33 = vpack.c.bf16 %v1297_v27, %v1297_v27 }
  0x29   :  { %1945 = vmatmul.msk.bf16.gmra.mxu0 %vm143_vm1, %v2089_v37 }
  0x2c   :  { %590 = vperm.xlu0 %2154, %v372_v41   ;;  %455 = vperm.xlu1 %2155, %v357_v42  }
  0x2d   :  { %464 = vperm.xlu2 %2156, %v358_v43   ;;  %v2102_v43 = vld [vmem:[%s2998_s1 + $0x78] sm:$0xff] }
  0x2e   :  { %1958 = vmatmul.msk.bf16.gmra.mxu3 %vm143_vm1, %v2102_v43 }
  0x34   :  { %563 = vperm.xlu0 %2154, %v369_v47   ;;  %572 = vperm.xlu1 %2155, %v370_v48   ;;  %v1318_v47 = vpack.c.bf16 %v1286_v44, %v1286_v44 }
  0x35   :  { %437 = vperm.xlu2 %2156, %v355_v49   ;;  %v1281_v49 = vld [vmem:[%s2999_s4 + $0x10] sm:$0xff] }
  0x39   :  { %1946 = vmatmul.msk.bf16.gmra.mxu0 %vm143_vm1, %v2090_v50  ;;  %v1282_v50 = vld [vmem:[%s2999_s4 + $0x18] sm:$0xff] }
  0x3c   :  { %545 = vperm.xlu1 %2155, %v367_v54   ;;  %446 = vperm.xlu0 %2154, %v356_v55   ;;  %v1313_v54 = vpack.c.bf16 %v1281_v49, %v1281_v49  ;;  %v1314_v55 = vpack.c.bf16 %v1282_v50, %v1282_v50 }
  0x3d   :  { %554 = vperm.xlu2 %2156, %v368_v56   ;;  %v1315_v56 = vpack.c.bf16 %v1283_v53, %v1283_v53 }
  0x44   :  { %428 = vperm.xlu1 %2155, %v354_v60   ;;  %419 = vperm.xlu0 %2154, %v353_v61   ;;  %v1279_v60 = vld [vmem:[%s2999_s4] sm:$0xff] }
  0x45   :  { %527 = vperm.xlu2 %2156, %v365_v62   ;;  %v1311_v2 = vpack.c.bf16 %v1279_v60, %v1279_v60 }
  0x49   :  { %1947 = vmatmul.msk.bf16.gmra.mxu0 %vm143_vm1, %v2091_v63 }
  0x4c   :  { %536 = vperm.xlu0 %2154, %v366_v3   ;;  %401 = vperm.xlu1 %2155, %v351_v4   ;;  %v1340_v3 = vpack.c.bf16 %v1308_v0, %v1308_v0  ;;  %v1303_v4 = vld [vmem:[%s2999_s4 + $0xc0] sm:$0xff] }
  0x4d   :  { %410 = vperm.xlu2 %2156, %v352_v5   ;;  %v1304_v5 = vld [vmem:[%s2999_s4 + $0xc8] sm:$0xff]  ;;  %v1335_v11 = vpack.c.bf16 %v1303_v4, %v1303_v4 }
  0x4e   :  { %v1336_v12 = vpack.c.bf16 %v1304_v5, %v1304_v5 }
  0x54   :  { %392 = vperm.xlu1 %2155, %v350_v8   ;;  %383 = vperm.xlu0 %2154, %v349_v9  }
  0x55   :  { %1471 = vperm.xlu2 %2156, %v1325_v21   ;;  %v1280_v21 = vld [vmem:[%s2999_s4 + $0x8] sm:$0xff] }
  0x56   :  { %v1312_v24 = vpack.c.bf16 %v1280_v21, %v1280_v21 }
  0x59   :  { %1948 = vmatmul.msk.bf16.gmra.mxu0 %vm143_vm1, %v2092_v10  ;;  %v1305_v10 = vld [vmem:[%s2999_s4 + $0xd0] sm:$0xff] }
  0x5c   :  { %1480 = vperm.xlu0 %2154, %v1326_v13   ;;  %1453 = vperm.xlu1 %2155, %v1323_v14   ;;  %v1337_v13 = vpack.c.bf16 %v1305_v10, %v1305_v10  ;;  %v2096_v14 = vld [vmem:[%s2998_s1 + $0x48] sm:$0xff] }
  0x5d   :  { %1462 = vperm.xlu2 %2156, %v1324_v30  }
  0x5f   :  { %v2337_v17 = vpop.permute.xlu2 %509 }
  0x64   :  { %1435 = vperm.xlu0 %2154, %v1321_v19   ;;  %1444 = vperm.xlu1 %2155, %v1322_v20  }
  0x65   :  { %1417 = vperm.xlu2 %2156, %v1319_v36  }
  0x67   :  { %v2351_v25 = vpop.permute.xlu2 %518 }
  0x69   :  { %1949 = vmatmul.msk.bf16.gmra.mxu0 %vm143_vm1, %v2093_v22  ;;  %v1334_v22 = vpack.c.bf16 %v1302_v15, %v1302_v15 }
  0x6c   :  { %1426 = vperm.xlu0 %2154, %v1320_v28   ;;  %1399 = vperm.xlu1 %2155, %v1317_v29   ;;  %v1298_v28 = vld [vmem:[%s2999_s4 + $0x98] sm:$0xff] }
  0x6d   :  { %1408 = vperm.xlu2 %2156, %v1318_v47  }
  0x6f   :  { %v2370_v37 = vpop.permute.xlu2 %491 }
  0x74   :  { %1615 = vperm.xlu0 %2154, %v1341_v34   ;;  %1624 = vperm.xlu1 %2155, %v1342_v35   ;;  %v1330_v34 = vpack.c.bf16 %v1298_v28, %v1298_v28  ;;  %v1333_v35 = vpack.c.bf16 %v1301_v32, %v1301_v32 }
  0x75   :  { %1381 = vperm.xlu2 %2156, %v1315_v56  }
  0x76   :  { %v2381_v41 = vpop.permute.xlu0 %653  ;;  %v2383_v42 = vpop.permute.xlu1 %635 }
  0x77   :  { %v2393_v48 = vpop.permute.xlu2 %608 }
  0x79   :  { %1950 = vmatmul.msk.bf16.gmra.mxu0 %vm143_vm1, %v2094_v38  ;;  %v2097_v38 = vld [vmem:[%s2998_s1 + $0x50] sm:$0xff] }
  0x7c   :  { %1390 = vperm.xlu0 %2154, %v1316_v45   ;;  %1597 = vperm.xlu1 %2155, %v1339_v46   ;;  %v1300_v45 = vld [vmem:[%s2999_s4 + $0xa8] sm:$0xff]  ;;  %v1328_v46 = vpack.c.bf16 %v1296_v39, %v1296_v39 }
  0x7d   :  { %1606 = vperm.xlu2 %2156, %v1340_v3   ;;  %v1332_v47 = vpack.c.bf16 %v1300_v45, %v1300_v45 }
  0x7e   :  { %v2401_v51 = vpop.permute.xlu0 %662  ;;  %v2403_v52 = vpop.permute.xlu1 %644 }
  0x7f   :  { %v2408_v57 = vpop.permute.xlu2 %581 }
  0x84   :  { %1363 = vperm.xlu0 %2154, %v1313_v54   ;;  %1372 = vperm.xlu1 %2155, %v1314_v55   ;;  %v1295_v55 = vld [vmem:[%s2999_s4 + $0x80] sm:$0xff] }
  0x85   :  { %1579 = vperm.xlu2 %2156, %v1337_v13   ;;  %v1327_v56 = vpack.c.bf16 %v1295_v55, %v1295_v55 }
  0x86   :  { %v2419_v61 = vpop.f32.mrf.mxu0  ;;  %v2421_v62 = vpop.permute.xlu1 %626 }
  0x87   :  { %v2423_v63 = vpop.permute.xlu0 %617  ;;  %v2439_v8 = vpop.permute.xlu2 %464 }
  0x89   :  { %1951 = vmatmul.msk.bf16.gmra.mxu0 %vm143_vm1, %v2095_v58  ;;  %v2158_v58 = vmov 839922192  }
  0x8a   :  { %v387_v59 = vunpack.c.l.s4 %v2158_v58 }
  0x8c   :  { %1588 = vperm.xlu0 %2154, %v1338_v1   ;;  %1345 = vperm.xlu1 %2155, %v1311_v2   ;;  %v2503_v60 = vunpack.c.0.s8 %v387_v59  ;;  %v2098_v1 = vld [vmem:[%s2998_s1 + $0x58] sm:$0xff] }
  0x8d   :  { %1354 = vperm.xlu2 %2156, %v1312_v24  }
  0x8e   :  { %v2435_v6 = vpop.f32.mrf.mxu0  ;;  %v2437_v7 = vpop.permute.xlu1 %599 }
  0x8f   :  { %v2441_v9 = vpop.permute.xlu0 %500  ;;  %v438_v26 = vpop.permute.xlu2 %437 }
  0x90   :  { %v443_v13 = vperm.slane %v438_v26, %v2503_v60 }
  0x94   :  { %1561 = vperm.xlu0 %2154, %v1335_v11   ;;  %1570 = vperm.xlu1 %2155, %v1336_v12  }
  0x95   :  { %1543 = vperm.xlu2 %2156, %v1333_v35  }
  0x96   :  { %v2455_v18 = vpop.f32.mrf.mxu0  ;;  %v2457_v19 = vpop.permute.xlu1 %482 }
  0x97   :  { %v2459_v20 = vpop.permute.xlu0 %473  ;;  %v2480_v36 = vpop.permute.xlu2 %554  ;;  %v287_v26 = vpack.c.bf16 %v2455_v18, %v2455_v18 }
  0x99   :  { %1952 = vmatmul.msk.bf16.gmra.mxu0 %vm143_vm1, %v2096_v14 }
  0x9c   :  { %1552 = vperm.xlu0 %2154, %v1334_v22   ;;  %1525 = vperm.xlu1 %2155, %v1331_v23  }
  0x9d   :  { %1534 = vperm.xlu2 %2156, %v1332_v47  }
  0x9e   :  { %v2471_v29 = vpop.f32.mrf.mxu0  ;;  %v2473_v30 = vpop.permute.xlu1 %455 }
  0x9f   :  { %v2475_v31 = vpop.permute.xlu0 %590  ;;  %v2496_v49 = vpop.permute.xlu2 %527  ;;  %v288_v28 = vpack.c.bf16 %v2471_v29, %v2471_v29  ;;  %v671_v29 = vunpack.c.l.bf16 %v287_v26 }
  0xa1   :  { %v672_v55 = vunpack.c.l.bf16 %v288_v28 }
  0xa4   :  { %1507 = vperm.xlu0 %2154, %v1329_v33   ;;  %1516 = vperm.xlu1 %2155, %v1330_v34   ;;  %v707_v33 = vunpack.c.l.bf16 %v443_v13 }
  0xa5   :  { %1489 = vperm.xlu2 %2156, %v1327_v56  }
  0xa6   :  { %v215_v40 = vpop.f32.mrf.mxu0  ;;  %v2488_v43 = vpop.permute.xlu1 %572 }
  0xa7   :  { %v2490_v44 = vpop.permute.xlu0 %563  ;;  %v289_v2 = vpack.c.bf16 %v215_v40, %v215_v40  ;;  %v411_v5 = vpop.permute.xlu2 %410 }
  0xa8   :  { %v416_v22 = vperm.slane %v411_v5, %v2503_v60 }
  0xa9   :  { %1953 = vmatmul.msk.bf16.gmra.mxu0 %vm143_vm1, %v2097_v38  ;;  %v673_v21 = vunpack.c.l.bf16 %v289_v2 }
  0xaa   :  { %v704_v38 = vunpack.c.l.bf16 %v416_v22 }
  0xac   :  { %1498 = vperm.xlu0 %2154, %v1328_v46   ;;  %v736_v18 = vadd.f32 %v704_v38, %v672_v55 }
  0xae   :  { %v217_v50 = vpop.f32.mrf.mxu0  ;;  %v2498_v53 = vpop.permute.xlu1 %545 }
  0xaf   :  { %v447_v54 = vpop.permute.xlu0 %446  ;;  %v290_v0 = vpack.c.bf16 %v217_v50, %v217_v50 }
  0xb0   :  { %v452_v24 = vperm.slane %v447_v54, %v2503_v60 }
  0xb1   :  { %v674_v14 = vunpack.c.l.bf16 %v290_v0 }
  0xb2   :  { %v708_v46 = vunpack.c.l.bf16 %v452_v24 }
  0xb6   :  { %v220_v3 = vpop.f32.mrf.mxu0  ;;  %v429_v4 = vpop.permute.xlu1 %428 }
  0xb7   :  { %v434_v10 = vperm.slane %v429_v4, %v2503_v60  ;;  %v420_v11 = vpop.permute.xlu0 %419  ;;  %v291_v15 = vpack.c.bf16 %v220_v3, %v220_v3  ;;  %v286_v3 = vpack.c.bf16 %v2435_v6, %v2435_v6  ;;  %v2099_v4 = vld [vmem:[%s2998_s1 + $0x60] sm:$0xff] }
  0xb8   :  { %v425_v12 = vperm.slane %v420_v11, %v2503_v60 }
  0xb9   :  { %v706_v16 = vunpack.c.l.bf16 %v434_v10  ;;  %1954 = vmatmul.msk.bf16.gmra.mxu0 %vm143_vm1, %v2098_v1  ;;  %v675_v34 = vunpack.c.l.bf16 %v291_v15  ;;  %v832_v15 = vmax.f32 %v736_v18, 0.0  ;;  %v670_v24 = vunpack.c.l.bf16 %v286_v3 }
  0xba   :  { %v705_v23 = vunpack.c.l.bf16 %v425_v12  ;;  %v285_v12 = vpack.c.bf16 %v2419_v61, %v2419_v61  ;;  %v506_v3 = vperm.slane %v2441_v9, %v2503_v60 }
  0xbb   :  { %v738_v27 = vadd.f32 %v706_v16, %v674_v14  ;;  %v739_v58 = vadd.f32 %v707_v33, %v675_v34 }
  0xbc   :  { %v737_v32 = vadd.f32 %v705_v23, %v673_v21  ;;  %v669_v28 = vunpack.c.l.bf16 %v285_v12 }
  0xbd   :  { %v834_v35 = vmax.f32 %v738_v27, 0.0  ;;  %v835_v5 = vmax.f32 %v739_v58, 0.0  ;;  %v515_v58 = vperm.slane %v2337_v17, %v2503_v60  ;;  %v668_v17 = vperm.slane %v2401_v51, %v2503_v60 }
  0xbe   :  { %v222_v39 = vpop.f32.mrf.mxu0  ;;  %v402_v40 = vpop.permute.xlu1 %401  ;;  %v833_v45 = vmax.f32 %v737_v32, 0.0 }
  0xbf   :  { %v292_v47 = vpack.c.bf16 %v222_v39, %v222_v39  ;;  %v2518_v50 = vpop.permute.xlu0 %536  ;;  %v407_v54 = vperm.slane %v402_v40, %v2503_v60  ;;  %v2100_v39 = vld [vmem:[%s2998_s1 + $0x68] sm:$0xff] }
  0xc0   :  { %v2521_v56 = vpack.c.bf16 %v834_v35, %v833_v45 }
  0xc1   :  { %v676_v59 = vunpack.c.l.bf16 %v292_v47  ;;  %v703_v0 = vunpack.c.l.bf16 %v407_v54  ;;  %v275_v47 = vpop.f32.mrf.mxu3 }
  0xc3   :  { %v740_v1 = vadd.f32 %v708_v46, %v676_v59  ;;  %v735_v2 = vadd.f32 %v703_v0, %v671_v29  ;;  %v524_v59 = vperm.slane %v2351_v25, %v2503_v60  ;;  %v497_v0 = vperm.slane %v2370_v37, %v2503_v60 }
  0xc4   :  { %v470_v25 = vperm.slane %v2439_v8, %v2503_v60  ;;  %v650_v8 = vperm.slane %v2403_v52, %v2503_v60  ;;  %v461_v52 = vperm.slane %v2473_v30, %v2503_v60 }
  0xc5   :  { %v836_v10 = vmax.f32 %v740_v1, 0.0  ;;  %v831_v11 = vmax.f32 %v735_v2, 0.0  ;;  %v659_v1 = vperm.slane %v2381_v41, %v2503_v60  ;;  %v641_v2 = vperm.slane %v2383_v42, %v2503_v60 }
  0xc6   :  { %v2530_v13 = vpop.f32.mrf.mxu0  ;;  %v393_v14 = vpop.permute.xlu1 %392  ;;  %v488_v41 = vperm.slane %v2457_v19, %v2503_v60 }
  0xc7   :  { %v398_v16 = vperm.slane %v393_v14, %v2503_v60  ;;  %v384_v21 = vpop.permute.xlu0 %383  ;;  %v2533_v22 = vpack.c.bf16 %v836_v10, %v835_v5  ;;  %v2536_v23 = vpack.c.bf16 %v832_v15, %v831_v11  ;;  %v715_v5 = vunpack.c.l.bf16 %v515_v58 }
  0xc8   :  { %v389_v6 = vperm.slane %v384_v21, %v2503_v60  ;;  %v716_v10 = vunpack.c.l.bf16 %v524_v59  ;;  %v713_v11 = vunpack.c.l.bf16 %v497_v0  ;;  %v731_v42 = vunpack.c.l.bf16 %v659_v1 }
  0xc9   :  { %v702_v27 = vunpack.c.l.bf16 %v398_v16  ;;  %1955 = vmatmul.msk.bf16.gmra.mxu0 %vm143_vm1, %v2099_v4  ;;  %v2547_v55 = vpop.f32.mrf.mxu3  ;;  %v729_v15 = vunpack.c.l.bf16 %v641_v2  ;;  %v714_v16 = vunpack.c.l.bf16 %v506_v3  ;;  %v712_v19 = vunpack.c.l.bf16 %v488_v41 }
  0xca   :  { %v701_v32 = vunpack.c.l.bf16 %v389_v6  ;;  %v479_v6 = vperm.slane %v2459_v20, %v2503_v60 }
  0xcb   :  { %v734_v61 = vadd.f32 %v702_v27, %v670_v24 }
  0xcc   :  { %v733_v33 = vadd.f32 %v701_v32, %v669_v28  ;;  %v732_v28 = vunpack.c.l.bf16 %v668_v17  ;;  %v710_v32 = vunpack.c.l.bf16 %v470_v25 }
  0xcd   :  { %v830_v26 = vmax.f32 %v734_v61, 0.0 }
  0xce   :  { %v2539_v34 = vpop.f32.mrf.mxu0  ;;  %v829_v35 = vmax.f32 %v733_v33, 0.0 }
  0xd0   :  { %v2541_v38 = vpack.c.bf16 %v830_v26, %v829_v35 }
  0xd1   :  { %v280_v37 = vpop.f32.mrf.mxu3 }
  0xd2   :  { %v315_v27 = vpack.c.bf16 %v280_v37, %v280_v37 }
  0xd4   :  { %v699_v59 = vunpack.c.l.bf16 %v315_v27 }
  0xd6   :  { %v230_v40 = vpop.f32.mrf.mxu0  ;;  %v763_v41 = vadd.f32 %v731_v42, %v699_v59 }
  0xd7   :  { %v295_v61 = vpack.c.bf16 %v230_v40, %v230_v40  ;;  %v293_v40 = vpack.c.bf16 %v2530_v13, %v2530_v13  ;;  %v709_v13 = vunpack.c.l.bf16 %v461_v52  ;;  %v551_v52 = vperm.slane %v2498_v53, %v2503_v60 }
  0xd8   :  { %v859_v42 = vmax.f32 %v763_v41, 0.0  ;;  %v560_v53 = vperm.slane %v2480_v36, %v2503_v60 }
  0xd9   :  { %1956 = vmatmul.msk.bf16.gmra.mxu0 %vm143_vm1, %v2100_v39  ;;  %v533_v39 = vperm.slane %v2496_v49, %v2503_v60  ;;  %v679_v0 = vunpack.c.l.bf16 %v295_v61  ;;  %v282_v49 = vpop.f32.mrf.mxu3 }
  0xda   :  { %v316_v3 = vpack.c.bf16 %v282_v49, %v282_v49 }
  0xde   :  { %v232_v45 = vpop.f32.mrf.mxu0 }
  0xdf   :  { %v296_v9 = vpack.c.bf16 %v232_v45, %v232_v45  ;;  %v294_v45 = vpack.c.bf16 %v2539_v34, %v2539_v34 }
  0xe1   :  { %v680_v20 = vunpack.c.l.bf16 %v296_v9  ;;  %v677_v9 = vunpack.c.l.bf16 %v293_v40 }
  0xe6   :  { %v235_v46 = vpop.f32.mrf.mxu0 }
  0xe7   :  { %v297_v12 = vpack.c.bf16 %v235_v46, %v235_v46  ;;  %v313_v46 = vpack.c.bf16 %v275_v47, %v275_v47  ;;  %v717_v47 = vunpack.c.l.bf16 %v533_v39 }
  0xe9   :  { %v681_v33 = vunpack.c.l.bf16 %v297_v12  ;;  %v697_v17 = vunpack.c.l.bf16 %v313_v46  ;;  %v730_v12 = vunpack.c.l.bf16 %v650_v8 }
  0xeb   :  { %v745_v1 = vadd.f32 %v713_v11, %v681_v33 }
  0xed   :  { %v841_v11 = vmax.f32 %v745_v1, 0.0 }
  0xee   :  { %v237_v54 = vpop.f32.mrf.mxu0 }
  0xef   :  { %v298_v4 = vpack.c.bf16 %v237_v54, %v237_v54  ;;  %v711_v54 = vunpack.c.l.bf16 %v479_v6  ;;  %v542_v6 = vperm.slane %v2518_v50, %v2503_v60 }
  0xf1   :  { %v682_v24 = vunpack.c.l.bf16 %v298_v4  ;;  %v678_v4 = vunpack.c.l.bf16 %v294_v45  ;;  %v718_v45 = vunpack.c.l.bf16 %v542_v6 }
  0xf6   :  { %v240_v29 = vpop.f32.mrf.mxu0 }
  0xf7   :  { %v299_v18 = vpack.c.bf16 %v240_v29, %v240_v29  ;;  %v746_v29 = vadd.f32 %v714_v16, %v682_v24  ;;  %v700_v16 = vunpack.c.l.bf16 %v316_v3  ;;  %v742_v24 = vadd.f32 %v710_v32, %v678_v4 }
  0xf9   :  { %v683_v14 = vunpack.c.l.bf16 %v299_v18  ;;  %v314_v18 = vpack.c.bf16 %v2547_v55, %v2547_v55  ;;  %v842_v30 = vmax.f32 %v746_v29, 0.0  ;;  %v743_v55 = vadd.f32 %v711_v54, %v679_v0 }
  0xfa   :  { %v764_v27 = vadd.f32 %v732_v28, %v700_v16 }
  0xfb   :  { %v747_v26 = vadd.f32 %v715_v5, %v683_v14  ;;  %v744_v5 = vadd.f32 %v712_v19, %v680_v20  ;;  %v698_v14 = vunpack.c.l.bf16 %v314_v18  ;;  %v761_v19 = vadd.f32 %v729_v15, %v697_v17 }
  0xfc   :  { %v867_v33 = vpack.c.bf16 %v842_v30, %v841_v11  ;;  %v839_v39 = vmax.f32 %v743_v55, 0.0 }
  0xfd   :  { %v843_v2 = vmax.f32 %v747_v26, 0.0  ;;  %v762_v8 = vadd.f32 %v730_v12, %v698_v14  ;;  %v860_v26 = vmax.f32 %v764_v27, 0.0  ;;  %v857_v50 = vmax.f32 %v761_v19, 0.0 }
  0xfe   :  { %v242_v21 = vpop.f32.mrf.mxu0 }
  0xff   :  { %v300_v51 = vpack.c.bf16 %v242_v21, %v242_v21  ;;  %v876_v46 = vpack.c.bf16 %v860_v26, %v859_v42  ;;  %v858_v32 = vmax.f32 %v762_v8, 0.0  ;;  %v596_v42 = vperm.slane %v2475_v31, %v2503_v60  ;;  %v2073_v26 = vld [vmem:[%s3000_s3 + $0xe0] sm:$0xf] }
 0x101   :  { %v684_v35 = vunpack.c.l.bf16 %v300_v51  ;;  %v840_v51 = vmax.f32 %v744_v5, 0.0  ;;  %1158 = vmatpush.bf16.msra.mxu2 %v876_v46  ;;  %v875_v59 = vpack.c.bf16 %v858_v32, %v857_v50 }
 0x103   :  { %v748_v58 = vadd.f32 %v716_v10, %v684_v35  ;;  %v741_v35 = vadd.f32 %v709_v13, %v677_v9  ;;  %v866_v29 = vpack.c.bf16 %v840_v51, %v839_v39 }
 0x105   :  { %v844_v34 = vmax.f32 %v748_v58, 0.0  ;;  %v838_v58 = vmax.f32 %v742_v24, 0.0  ;;  %v837_v15 = vmax.f32 %v741_v35, 0.0  ;;  %1159 = vmatpush.bf16.msra.mxu2 %v875_v59  ;;  %v2132_v35 = vld [vmem:[%s3000_s3 + $0xe4] sm:$0xf0] }
 0x106   :  { %v245_v10 = vpop.f32.mrf.mxu0 }
 0x107   :  { %v301_v25 = vpack.c.bf16 %v245_v10, %v245_v10  ;;  %v868_v37 = vpack.c.bf16 %v844_v34, %v843_v2  ;;  %v865_v0 = vpack.c.bf16 %v838_v58, %v837_v15  ;;  %v719_v2 = vunpack.c.l.bf16 %v551_v52 }
 0x108   :  { %v720_v10 = vunpack.c.l.bf16 %v560_v53  ;;  %v614_v52 = vperm.slane %v2393_v48, %v2503_v60 }
 0x109   :  { %v685_v21 = vunpack.c.l.bf16 %v301_v25  ;;  %1069 = vmatpush.bf16.msra.mxu1 %v868_v37  ;;  %2136 = vmatpush.bf16.msrb.mxu3 %v868_v37  ;;  %v569_v37 = vperm.slane %v2490_v44, %v2503_v60  ;;  %v2065_v44 = vld [vmem:[%s3000_s3 + $0xd0] sm:$0xf] }
 0x10b   :  { %v749_v61 = vadd.f32 %v717_v47, %v685_v21 }
 0x10d   :  { %1070 = vmatpush.bf16.msra.mxu1 %v867_v33  ;;  %2137 = vmatpush.bf16.msrb.mxu3 %v867_v33  ;;  %v845_v18 = vmax.f32 %v749_v61, 0.0  ;;  %v587_v33 = vperm.slane %v2408_v57, %v2503_v60 }
 0x10e   :  { %v247_v20 = vpop.f32.mrf.mxu0 }
 0x10f   :  { %v302_v54 = vpack.c.bf16 %v247_v20, %v247_v20  ;;  %v723_v20 = vunpack.c.l.bf16 %v587_v33 }
 0x111   :  { %v686_v28 = vunpack.c.l.bf16 %v302_v54  ;;  %1071 = vmatpush.bf16.msra.mxu1 %v866_v29  ;;  %2138 = vmatpush.bf16.msrb.mxu3 %v866_v29  ;;  %v724_v54 = vunpack.c.l.bf16 %v596_v42 }
 0x113   :  { %v750_v40 = vadd.f32 %v718_v45, %v686_v28  ;;  %v2074_v45 = vor.u32 %v2132_v35, %v2073_v26  ;;  %v2110_v26 = vld [vmem:[%s3000_s3 + $0x34] sm:$0xf0]  ;;  %v2105_v35 = vld [vmem:[%s3000_s3 + $0x14] sm:$0xf] }
 0x115   :  { %1072 = vmatpush.bf16.msra.mxu1 %v865_v0  ;;  %2139 = vmatpush.bf16.msrb.mxu3 %v865_v0  ;;  %v846_v49 = vmax.f32 %v750_v40, 0.0  ;;  %v2081_v0 = vld [vmem:[%s3000_s3 + $0xf0] sm:$0xf] }
 0x116   :  { %v250_v1 = vpop.f32.mrf.mxu0 }
 0x117   :  { %v303_v34 = vpack.c.bf16 %v250_v1, %v250_v1  ;;  %v2585_v3 = vpack.c.bf16 %v846_v49, %v845_v18  ;;  %v2134_v18 = vld [vmem:[%s3000_s3 + $0xf4] sm:$0xf0] }
 0x118   :  { %v2082_v1 = vor.u32 %v2134_v18, %v2081_v0  ;;  %v2109_v0 = vld [vmem:[%s3000_s3 + $0x34] sm:$0xf]  ;;  %v1987_v18 = vld [vmem:[%s3000_s3 + $0x38] sm:$0xf0] }
 0x119   :  { %v687_v47 = vunpack.c.l.bf16 %v303_v34  ;;  %1073 = vmatpush.bf16.msra.mxu1 %v2533_v22  ;;  %2140 = vmatpush.bf16.msrb.mxu3 %v2533_v22 }
 0x11b   :  { %v751_v4 = vadd.f32 %v719_v2, %v687_v47  ;;  %v726_v47 = vunpack.c.l.bf16 %v614_v52  ;;  %v2001_v52 = vld [vmem:[%s3000_s3 + $0x50] sm:$0xf] }
 0x11d   :  { %1074 = vmatpush.bf16.msra.mxu1 %v2521_v56  ;;  %2141 = vmatpush.bf16.msrb.mxu3 %v2521_v56  ;;  %v847_v36 = vmax.f32 %v751_v4, 0.0  ;;  %v721_v56 = vunpack.c.l.bf16 %v569_v37  ;;  %v623_v37 = vperm.slane %v2423_v63, %v2503_v60 }
 0x11e   :  { %v252_v5 = vpop.f32.mrf.mxu0 }
 0x11f   :  { %v304_v17 = vpack.c.bf16 %v252_v5, %v252_v5 }
 0x121   :  { %v688_v25 = vunpack.c.l.bf16 %v304_v17  ;;  %1075 = vmatpush.bf16.msra.mxu1 %v2536_v23  ;;  %2142 = vmatpush.bf16.msrb.mxu3 %v2536_v23  ;;  %v578_v23 = vperm.slane %v2488_v43, %v2503_v60 }
 0x123   :  { %v752_v22 = vadd.f32 %v720_v10, %v688_v25  ;;  %v722_v11 = vunpack.c.l.bf16 %v578_v23 }
 0x125   :  { %1076 = vmatpush.bf16.msra.mxu1 %v2541_v38  ;;  %2143 = vmatpush.bf16.msrb.mxu3 %v2541_v38  ;;  %v848_v30 = vmax.f32 %v752_v22, 0.0  ;;  %v2130_v38 = vld [vmem:[%s3000_s3 + $0xd4] sm:$0xf0]  ;;  %v1961_v22 = vld [vmem:[%s3000_s3] sm:$0xf] }
 0x126   :  { %v255_v41 = vpop.f32.mrf.mxu0  ;;  %v2066_v55 = vor.u32 %v2130_v38, %v2065_v44 }
 0x127   :  { %v305_v12 = vpack.c.bf16 %v255_v41, %v255_v41  ;;  %v2599_v13 = vpack.c.bf16 %v848_v30, %v847_v36  ;;  %v2104_v36 = vld [vmem:[%s3000_s3 + $0x4] sm:$0xf0]  ;;  %v632_v41 = vperm.slane %v2421_v62, %v2503_v60  ;;  %v2106_v62 = vld [vmem:[%s3000_s3 + $0x14] sm:$0xf0] }
 0x128   :  { %1142 = vmatmul.bf16.vlgmr.msrb.gmra.mxu3 %v2066_v55  ;;  %v1962_v30 = vor.u32 %v2104_v36, %v1961_v22  ;;  %v2745_v36 = vpop.permute.xlu1 %1453 }
 0x129   :  { %2144 = vmatpush.bf16.msra.mxu3 %v876_v46  ;;  %v689_v14 = vunpack.c.l.bf16 %v305_v12  ;;  %v728_v23 = vunpack.c.l.bf16 %v632_v41 }
 0x12a   :  { %1077 = vmatmul.bf16.vlgmr.msra.gmra.mxu1 %v1962_v30 }
 0x12b   :  { %v753_v16 = vadd.f32 %v721_v56, %v689_v14  ;;  %v727_v14 = vunpack.c.l.bf16 %v623_v37 }
 0x12d   :  { %2145 = vmatpush.bf16.msra.mxu3 %v875_v59  ;;  %v849_v51 = vmax.f32 %v753_v16, 0.0  ;;  %v605_v59 = vperm.slane %v2437_v7, %v2503_v60 }
 0x12e   :  { %v257_v9 = vpop.f32.mrf.mxu0 }
 0x12f   :  { %v306_v21 = vpack.c.bf16 %v257_v9, %v257_v9  ;;  %v725_v2 = vunpack.c.l.bf16 %v605_v59 }
 0x130   :  { %v2749_v41 = vpop.permute.xlu1 %1444 }
 0x131   :  { %v690_v6 = vunpack.c.l.bf16 %v306_v21 }
 0x133   :  { %v754_v24 = vadd.f32 %v722_v11, %v690_v6  ;;  %v1969_v11 = vld [vmem:[%s3000_s3 + $0x10] sm:$0xf] }
 0x134   :  { %v1970_v6 = vor.u32 %v2106_v62, %v1969_v11  ;;  %v2769_v11 = vpop.permute.xlu0 %1480  ;;  %v2117_v62 = vld [vmem:[%s3000_s3 + $0x74] sm:$0xf] }
 0x135   :  { %v850_v27 = vmax.f32 %v754_v24, 0.0  ;;  %v1977_v24 = vld [vmem:[%s3000_s3 + $0x20] sm:$0xf] }
 0x136   :  { %v260_v61 = vpop.f32.mrf.mxu0 }
 0x137   :  { %v2609_v19 = vpack.c.bf16 %v850_v27, %v849_v51  ;;  %v307_v43 = vpack.c.bf16 %v260_v61, %v260_v61  ;;  %v2108_v51 = vld [vmem:[%s3000_s3 + $0x24] sm:$0xf0]  ;;  %v2103_v27 = vld [vmem:[%s3000_s3 + $0x4] sm:$0xf]  ;;  %v1963_v61 = vld [vmem:[%s3000_s3 + $0x8] sm:$0xf0] }
 0x138   :  { %1147 = vmatmul.bf16.gmra.mxu3 %v2074_v45  ;;  %v1978_v33 = vor.u32 %v2108_v51, %v1977_v24  ;;  %v1966_v42 = vor.u32 %v2103_v27, %v1963_v61  ;;  %v2075_v45 = vld [vmem:[%s3000_s3 + $0xe8] sm:$0xf0]  ;;  %v2033_v27 = vld [vmem:[%s3000_s3 + $0x90] sm:$0xf]  ;;  %v2122_v61 = vld [vmem:[%s3000_s3 + $0x94] sm:$0xf0] }
 0x139   :  { %v691_v8 = vunpack.c.l.bf16 %v307_v43  ;;  %v2067_v43 = vld [vmem:[%s3000_s3 + $0xd8] sm:$0xf0] }
 0x13a   :  { %1082 = vmatmul.bf16.gmra.mxu1 %v1970_v6  ;;  %v2019_v6 = vld [vmem:[%s3000_s3 + $0x78] sm:$0xf0] }
 0x13b   :  { %v755_v29 = vadd.f32 %v723_v20, %v691_v8 }
 0x13d   :  { %v851_v50 = vmax.f32 %v755_v29, 0.0  ;;  %v1993_v29 = vld [vmem:[%s3000_s3 + $0x40] sm:$0xf] }
 0x13e   :  { %v262_v39 = vpop.f32.mrf.mxu0 }
 0x13f   :  { %v308_v46 = vpack.c.bf16 %v262_v39, %v262_v39  ;;  %v1971_v39 = vld [vmem:[%s3000_s3 + $0x18] sm:$0xf0] }
 0x141   :  { %v692_v57 = vunpack.c.l.bf16 %v308_v46  ;;  %v1974_v46 = vor.u32 %v2105_v35, %v1971_v39  ;;  %v2119_v35 = vld [vmem:[%s3000_s3 + $0x84] sm:$0xf]  ;;  %v2027_v39 = vld [vmem:[%s3000_s3 + $0x88] sm:$0xf0] }
 0x143   :  { %v756_v58 = vadd.f32 %v724_v54, %v692_v57  ;;  %v2112_v57 = vld [vmem:[%s3000_s3 + $0x44] sm:$0xf0] }
 0x145   :  { %v852_v31 = vmax.f32 %v756_v58, 0.0  ;;  %v2107_v58 = vld [vmem:[%s3000_s3 + $0x24] sm:$0xf] }
 0x146   :  { %v265_v32 = vpop.f32.mrf.mxu0 }
 0x147   :  { %v872_v28 = vpack.c.bf16 %v852_v31, %v851_v50  ;;  %v309_v15 = vpack.c.bf16 %v265_v32, %v265_v32  ;;  %v1979_v50 = vld [vmem:[%s3000_s3 + $0x28] sm:$0xf0]  ;;  %v2133_v31 = vld [vmem:[%s3000_s3 + $0xf4] sm:$0xf]  ;;  %v2083_v32 = vld [vmem:[%s3000_s3 + $0xf8] sm:$0xf0] }
 0x148   :  { %1152 = vmatmul.bf16.gmra.mxu3 %v2082_v1  ;;  %v2086_v59 = vor.u32 %v2133_v31, %v2083_v32  ;;  %v1990_v1 = vor.u32 %v2109_v0, %v1987_v18 }
 0x149   :  { %v693_v40 = vunpack.c.l.bf16 %v309_v15  ;;  %v1982_v15 = vor.u32 %v2107_v58, %v1979_v50 }
 0x14a   :  { %1087 = vmatmul.bf16.gmra.mxu1 %v1978_v33 }
 0x14b   :  { %v757_v53 = vadd.f32 %v725_v2, %v693_v40  ;;  %v2114_v40 = vld [vmem:[%s3000_s3 + $0x54] sm:$0xf0]  ;;  %v2009_v2 = vld [vmem:[%s3000_s3 + $0x60] sm:$0xf] }
 0x14d   :  { %v853_v5 = vmax.f32 %v757_v53, 0.0  ;;  %v1995_v53 = vld [vmem:[%s3000_s3 + $0x48] sm:$0xf0] }
 0x14e   :  { %v267_v49 = vpop.f32.mrf.mxu0 }
 0x14f   :  { %v310_v34 = vpack.c.bf16 %v267_v49, %v267_v49  ;;  %v2002_v49 = vor.u32 %v2114_v40, %v2001_v52  ;;  %v2121_v52 = vld [vmem:[%s3000_s3 + $0x94] sm:$0xf]  ;;  %v2035_v40 = vld [vmem:[%s3000_s3 + $0x98] sm:$0xf0] }
 0x151   :  { %v694_v7 = vunpack.c.l.bf16 %v310_v34  ;;  %v2116_v34 = vld [vmem:[%s3000_s3 + $0x64] sm:$0xf0] }
 0x153   :  { %v758_v4 = vadd.f32 %v726_v47, %v694_v7  ;;  %v2111_v47 = vld [vmem:[%s3000_s3 + $0x44] sm:$0xf]  ;;  %v2010_v7 = vor.u32 %v2116_v34, %v2009_v2  ;;  %v2126_v2 = vld [vmem:[%s3000_s3 + $0xb4] sm:$0xf0] }
 0x155   :  { %v854_v48 = vmax.f32 %v758_v4, 0.0  ;;  %v1998_v4 = vor.u32 %v2111_v47, %v1995_v53 }
 0x156   :  { %v270_v10 = vpop.f32.mrf.mxu0 }
 0x157   :  { %v873_v17 = vpack.c.bf16 %v854_v48, %v853_v5  ;;  %v311_v25 = vpack.c.bf16 %v270_v10, %v270_v10  ;;  %v2731_v5 = vpop.permute.xlu2 %1471  ;;  %v2017_v48 = vld [vmem:[%s3000_s3 + $0x70] sm:$0xf]  ;;  %v2118_v10 = vld [vmem:[%s3000_s3 + $0x74] sm:$0xf0] }
 0x158   :  { %v2018_v37 = vor.u32 %v2118_v10, %v2017_v48 }
 0x159   :  { %v695_v56 = vunpack.c.l.bf16 %v311_v25  ;;  %v2003_v25 = vld [vmem:[%s3000_s3 + $0x58] sm:$0xf0] }
 0x15b   :  { %v759_v44 = vadd.f32 %v727_v14, %v695_v56  ;;  %v2025_v56 = vld [vmem:[%s3000_s3 + $0x80] sm:$0xf] }
 0x15d   :  { %v855_v55 = vmax.f32 %v759_v44, 0.0 }
 0x15e   :  { %v272_v12 = vpop.f32.mrf.mxu0 }
 0x15f   :  { %v312_v16 = vpack.c.bf16 %v272_v12, %v272_v12  ;;  %v2747_v30 = vpop.permute.xlu2 %1462  ;;  %v2120_v12 = vld [vmem:[%s3000_s3 + $0x84] sm:$0xf0] }
 0x160   :  { %v2026_v44 = vor.u32 %v2120_v12, %v2025_v56 }
 0x161   :  { %v696_v63 = vunpack.c.l.bf16 %v312_v16  ;;  %v2115_v16 = vld [vmem:[%s3000_s3 + $0x64] sm:$0xf] }
 0x163   :  { %v760_v38 = vadd.f32 %v728_v23, %v696_v63  ;;  %v2011_v23 = vld [vmem:[%s3000_s3 + $0x68] sm:$0xf0] }
 0x165   :  { %v856_v9 = vmax.f32 %v760_v38, 0.0  ;;  %v2014_v38 = vor.u32 %v2115_v16, %v2011_v23 }
 0x167   :  { %v874_v21 = vpack.c.bf16 %v856_v9, %v855_v55  ;;  %v2757_v14 = vpop.permute.xlu2 %1417  ;;  %v2765_v9 = vpop.permute.xlu1 %1399 }
 0x169   :  { %1160 = vmatpush.bf16.msra.mxu2 %v874_v21  ;;  %2146 = vmatpush.bf16.msra.mxu3 %v874_v21 }
 0x16d   :  { %1161 = vmatpush.bf16.msra.mxu2 %v873_v17  ;;  %2147 = vmatpush.bf16.msra.mxu3 %v873_v17  ;;  %v2113_v17 = vld [vmem:[%s3000_s3 + $0x54] sm:$0xf] }
 0x16e   :  { %v2006_v22 = vor.u32 %v2113_v17, %v2003_v25 }
 0x16f   :  { %v2767_v55 = vpop.permute.xlu2 %1408  ;;  %v2777_v24 = vpop.permute.xlu1 %1624 }
 0x171   :  { %1162 = vmatpush.bf16.msra.mxu2 %v872_v28  ;;  %2148 = vmatpush.bf16.msra.mxu3 %v872_v28  ;;  %v1994_v28 = vor.u32 %v2112_v57, %v1993_v29 }
 0x175   :  { %1163 = vmatpush.bf16.msra.mxu2 %v2609_v19  ;;  %2149 = vmatpush.bf16.msra.mxu3 %v2609_v19  ;;  %v2129_v19 = vld [vmem:[%s3000_s3 + $0xd4] sm:$0xf] }
 0x176   :  { %v2070_v8 = vor.u32 %v2129_v19, %v2067_v43  ;;  %v2022_v19 = vor.u32 %v2117_v62, %v2019_v6  ;;  %v2034_v43 = vor.u32 %v2122_v61, %v2033_v27  ;;  %v2123_v27 = vld [vmem:[%s3000_s3 + $0xa4] sm:$0xf]  ;;  %v2043_v61 = vld [vmem:[%s3000_s3 + $0xa8] sm:$0xf0] }
 0x177   :  { %v2785_v33 = vpop.permute.xlu2 %1381 }
 0x179   :  { %1164 = vmatpush.bf16.msra.mxu2 %v2599_v13  ;;  %2150 = vmatpush.bf16.msra.mxu3 %v2599_v13  ;;  %v1985_v13 = vld [vmem:[%s3000_s3 + $0x30] sm:$0xf] }
 0x17a   :  { %v1986_v20 = vor.u32 %v2110_v26, %v1985_v13  ;;  %v2789_v13 = vpop.permute.xlu1 %1597 }
 0x17c   :  { %1092 = vmatmul.bf16.gmra.mxu1 %v1986_v20  ;;  %v2041_v20 = vld [vmem:[%s3000_s3 + $0xa0] sm:$0xf] }
 0x17d   :  { %1165 = vmatpush.bf16.msra.mxu2 %v2585_v3  ;;  %2151 = vmatpush.bf16.msra.mxu3 %v2585_v3  ;;  %v2131_v3 = vld [vmem:[%s3000_s3 + $0xe4] sm:$0xf] }
 0x17e   :  { %v2078_v54 = vor.u32 %v2131_v3, %v2075_v45 }
 0x17f   :  { %v2791_v26 = vpop.permute.xlu2 %1606 }
 0x180   :  { %1166 = vmatmul.bf16.vlgmr.msra.gmra.mxu2 %v1966_v42  ;;  %1231 = vmatmul.bf16.vlgmr.msra.gmra.mxu3 %v2070_v8  ;;  %v2787_v42 = vpop.permute.xlu0 %1435 }
 0x182   :  { %v1373_v57 = vpop.permute.xlu1 %1372 }
 0x187   :  { %v2809_v58 = vpop.permute.xlu2 %1579 }
 0x188   :  { %v2799_v3 = vpop.permute.xlu0 %1426 }
 0x18c   :  { %1097 = vmatmul.bf16.gmra.mxu1 %v1994_v28 }
 0x18f   :  { %v1355_v18 = vpop.permute.xlu2 %1354 }
 0x190   :  { %1171 = vmatmul.bf16.gmra.mxu2 %v1974_v46  ;;  %1236 = vmatmul.bf16.gmra.mxu3 %v2078_v54  ;;  %v2124_v46 = vld [vmem:[%s3000_s3 + $0xa4] sm:$0xf0]  ;;  %v2030_v54 = vor.u32 %v2119_v35, %v2027_v39  ;;  %v2813_v28 = vpop.permute.xlu0 %1615  ;;  %v1360_v34 = vperm.slane %v1355_v18, %v2503_v60  ;;  %v1378_v39 = vperm.slane %v1373_v57, %v2503_v60 }
 0x191   :  { %v2042_v29 = vor.u32 %v2124_v46, %v2041_v20  ;;  %v2128_v35 = vld [vmem:[%s3000_s3 + $0xc4] sm:$0xf0] }
 0x198   :  { %v1391_v25 = vpop.permute.xlu0 %1390 }
 0x19c   :  { %1102 = vmatmul.bf16.gmra.mxu1 %v2002_v49 }
 0x1a0   :  { %1176 = vmatmul.bf16.gmra.mxu2 %v1982_v15  ;;  %1241 = vmatmul.bf16.gmra.mxu3 %v2086_v59  ;;  %v1346_v59 = vpop.permute.xlu1 %1345  ;;  %v1364_v6 = vpop.permute.xlu0 %1363 }
 0x1a1   :  { %v1351_v0 = vperm.slane %v1346_v59, %v2503_v60  ;;  %v1666_v59 = vunpack.c.l.bf16 %v1378_v39  ;;  %v1405_v39 = vperm.slane %v2765_v9, %v2503_v60 }
 0x1a3   :  { %v1663_v10 = vunpack.c.l.bf16 %v1351_v0 }
 0x1a7   :  { %v1078_v63 = vpop.f32.mrf.mxu1 }
 0x1ac   :  { %1107 = vmatmul.bf16.gmra.mxu1 %v2010_v7  ;;  %v2038_v7 = vor.u32 %v2121_v52, %v2035_v40 }
 0x1af   :  { %v1080_v21 = vpop.f32.mrf.mxu1 }
 0x1b0   :  { %1181 = vmatmul.bf16.gmra.mxu2 %v1990_v1  ;;  %v2049_v1 = vld [vmem:[%s3000_s3 + $0xb0] sm:$0xf] }
 0x1b1   :  { %v2050_v48 = vor.u32 %v2126_v2, %v2049_v1 }
 0x1b7   :  { %v1083_v51 = vpop.f32.mrf.mxu1 }
 0x1bc   :  { %1112 = vmatmul.bf16.gmra.mxu1 %v2018_v37  ;;  %v1664_v37 = vunpack.c.l.bf16 %v1360_v34 }
 0x1bf   :  { %v1085_v8 = vpop.f32.mrf.mxu1 }
 0x1c0   :  { %1186 = vmatmul.bf16.gmra.mxu2 %v1998_v4 }
 0x1c7   :  { %v2801_v45 = vpop.f32.mrf.mxu1 }
 0x1cc   :  { %1117 = vmatmul.bf16.gmra.mxu1 %v2026_v44 }
 0x1cf   :  { %v2811_v32 = vpop.f32.mrf.mxu1 }
 0x1d0   :  { %1191 = vmatmul.bf16.gmra.mxu2 %v2006_v22 }
 0x1dc   :  { %1122 = vmatmul.bf16.gmra.mxu1 %v2034_v43 }
 0x1e0   :  { %1196 = vmatmul.bf16.gmra.mxu2 %v2014_v38 }
 0x1ec   :  { %1127 = vmatmul.bf16.gmra.mxu1 %v2042_v29 }
 0x1f0   :  { %1201 = vmatmul.bf16.gmra.mxu2 %v2022_v19  ;;  %v1369_v19 = vperm.slane %v1364_v6, %v2503_v60 }
 0x1f9   :  { %v2829_v4 = vpop.f32.mrf.mxu1 }
 0x1fc   :  { %1132 = vmatmul.bf16.gmra.mxu1 %v2050_v48  ;;  %v1387_v48 = vperm.slane %v2785_v33, %v2503_v60 }
 0x200   :  { %1206 = vmatmul.bf16.gmra.mxu2 %v2030_v54  ;;  %v2046_v54 = vor.u32 %v2123_v27, %v2043_v61 }
 0x203   :  { %v1167_v50 = vpop.f32.mrf.mxu2 }
 0x204   :  { %v1168_v31 = vadd.f32 %v1167_v50, %v1078_v63  ;;  %v1665_v50 = vunpack.c.l.bf16 %v1369_v19 }
 0x206   :  { %v1247_v15 = vpack.c.bf16 %v1168_v31, %v1168_v31  ;;  %v2847_v31 = vpop.f32.mrf.mxu3 }
 0x208   :  { %v1631_v47 = vunpack.c.l.bf16 %v1247_v15 }
 0x20a   :  { %v1695_v22 = vadd.f32 %v1663_v10, %v1631_v47 }
 0x20b   :  { %v1169_v49 = vpop.f32.mrf.mxu2 }
 0x20c   :  { %v1170_v53 = vadd.f32 %v1169_v49, %v1080_v21  ;;  %v1791_v23 = vmax.f32 %v1695_v22, 0.0  ;;  %v1095_v21 = vpop.f32.mrf.mxu1 }
 0x20e   :  { %v1248_v17 = vpack.c.bf16 %v1170_v53, %v1170_v53  ;;  %v2125_v53 = vld [vmem:[%s3000_s3 + $0xb4] sm:$0xf] }
 0x210   :  { %v1632_v56 = vunpack.c.l.bf16 %v1248_v17  ;;  %1211 = vmatmul.bf16.gmra.mxu2 %v2038_v7  ;;  %v2051_v7 = vld [vmem:[%s3000_s3 + $0xb8] sm:$0xf0] }
 0x212   :  { %v1696_v12 = vadd.f32 %v1664_v37, %v1632_v56  ;;  %v2054_v56 = vor.u32 %v2125_v53, %v2051_v7 }
 0x213   :  { %v1172_v16 = vpop.f32.mrf.mxu2 }
 0x214   :  { %v1792_v44 = vmax.f32 %v1696_v12, 0.0  ;;  %v1173_v63 = vadd.f32 %v1172_v16, %v1083_v51  ;;  %v2057_v51 = vld [vmem:[%s3000_s3 + $0xc0] sm:$0xf]  ;;  %v1098_v0 = vpop.f32.mrf.mxu1  ;;  %v1667_v12 = vunpack.c.l.bf16 %v1387_v48 }
 0x215   :  { %v2058_v29 = vor.u32 %v2128_v35, %v2057_v51  ;;  %v2059_v35 = vld [vmem:[%s3000_s3 + $0xc8] sm:$0xf0] }
 0x216   :  { %v2831_v38 = vpack.c.bf16 %v1792_v44, %v1791_v23  ;;  %v1249_v62 = vpack.c.bf16 %v1173_v63, %v1173_v63 }
 0x217   :  { %1137 = vmatmul.bf16.gmra.mxu1 %v2058_v29 }
 0x218   :  { %v1633_v20 = vunpack.c.l.bf16 %v1249_v62 }
 0x21a   :  { %v1697_v52 = vadd.f32 %v1665_v50, %v1633_v20 }
 0x21b   :  { %v1174_v43 = vpop.f32.mrf.mxu2 }
 0x21c   :  { %v1175_v46 = vadd.f32 %v1174_v43, %v1085_v8  ;;  %v1793_v1 = vmax.f32 %v1697_v52, 0.0  ;;  %v2852_v8 = vpop.f32.mrf.mxu3  ;;  %v2862_v17 = vpop.f32.mrf.mxu1 }
 0x21e   :  { %v1250_v15 = vpack.c.bf16 %v1175_v46, %v1175_v46  ;;  %v1414_v46 = vperm.slane %v2767_v55, %v2503_v60 }
 0x220   :  { %v1634_v40 = vunpack.c.l.bf16 %v1250_v15  ;;  %1216 = vmatmul.bf16.gmra.mxu2 %v2046_v54  ;;  %v1669_v15 = vunpack.c.l.bf16 %v1405_v39 }
 0x222   :  { %v1698_v18 = vadd.f32 %v1666_v59, %v1634_v40  ;;  %v1670_v40 = vunpack.c.l.bf16 %v1414_v46  ;;  %v1477_v46 = vperm.slane %v2731_v5, %v2503_v60 }
 0x223   :  { %v1177_v49 = vpop.f32.mrf.mxu2 }
 0x224   :  { %v1794_v2 = vmax.f32 %v1698_v18, 0.0  ;;  %v1178_v57 = vadd.f32 %v1177_v49, %v2801_v45  ;;  %v1396_v45 = vperm.slane %v1391_v25, %v2503_v60  ;;  %v2866_v62 = vpop.f32.mrf.mxu3  ;;  %v1103_v43 = vpop.f32.mrf.mxu1 }
 0x226   :  { %v2850_v34 = vpack.c.bf16 %v1794_v2, %v1793_v1  ;;  %v1251_v47 = vpack.c.bf16 %v1178_v57, %v1178_v57  ;;  %v1668_v23 = vunpack.c.l.bf16 %v1396_v45 }
 0x228   :  { %v1635_v37 = vunpack.c.l.bf16 %v1251_v47 }
 0x22a   :  { %v1699_v44 = vadd.f32 %v1667_v12, %v1635_v37  ;;  %v2893_v12 = vpop.permute.xlu0 %1588 }
 0x22b   :  { %v1179_v10 = vpop.f32.mrf.mxu2 }
 0x22c   :  { %v1180_v22 = vadd.f32 %v1179_v10, %v2811_v32  ;;  %v1795_v33 = vmax.f32 %v1699_v44, 0.0  ;;  %v2127_v32 = vld [vmem:[%s3000_s3 + $0xc4] sm:$0xf]  ;;  %v1105_v52 = vpop.f32.mrf.mxu1 }
 0x22d   :  { %v2062_v50 = vor.u32 %v2127_v32, %v2059_v35 }
 0x22e   :  { %v1252_v16 = vpack.c.bf16 %v1180_v22, %v1180_v22 }
 0x230   :  { %v1636_v63 = vunpack.c.l.bf16 %v1252_v16  ;;  %1221 = vmatmul.bf16.gmra.mxu2 %v2054_v56 }
 0x232   :  { %v1700_v6 = vadd.f32 %v1668_v23, %v1636_v63  ;;  %v2897_v44 = vpop.permute.xlu0 %1561 }
 0x233   :  { %v1182_v27 = vpop.f32.mrf.mxu2 }
 0x234   :  { %v1796_v61 = vmax.f32 %v1700_v6, 0.0  ;;  %v1183_v19 = vadd.f32 %v1182_v27, %v2829_v4  ;;  %v2881_v4 = vpop.f32.mrf.mxu3  ;;  %v1108_v7 = vpop.f32.mrf.mxu1 }
 0x236   :  { %v2869_v25 = vpack.c.bf16 %v1796_v61, %v1795_v33  ;;  %v1253_v51 = vpack.c.bf16 %v1183_v19, %v1183_v19  ;;  %v2901_v33 = vpop.permute.xlu2 %1543 }
 0x238   :  { %v1637_v54 = vunpack.c.l.bf16 %v1253_v51 }
 0x23a   :  { %v1701_v18 = vadd.f32 %v1669_v15, %v1637_v54  ;;  %v2903_v19 = vpop.permute.xlu0 %1552 }
 0x23b   :  { %v1184_v20 = vpop.f32.mrf.mxu2 }
 0x23c   :  { %v1185_v29 = vadd.f32 %v1184_v20, %v1095_v21  ;;  %v1797_v57 = vmax.f32 %v1701_v18, 0.0  ;;  %v2885_v53 = vpop.f32.mrf.mxu3  ;;  %v1110_v45 = vpop.f32.mrf.mxu1  ;;  %v1486_v18 = vperm.slane %v2769_v11, %v2503_v60  ;;  %v1450_v11 = vperm.slane %v2749_v41, %v2503_v60 }
 0x23e   :  { %v1254_v59 = vpack.c.bf16 %v1185_v29, %v1185_v29 }
 0x240   :  { %v1638_v49 = vunpack.c.l.bf16 %v1254_v59  ;;  %1226 = vmatmul.bf16.gmra.mxu2 %v2062_v50  ;;  %v1468_v50 = vperm.slane %v2747_v30, %v2503_v60 }
 0x242   :  { %v1702_v1 = vadd.f32 %v1670_v40, %v1638_v49  ;;  %v2917_v5 = vpop.permute.xlu0 %1507 }
 0x243   :  { %v1187_v2 = vpop.f32.mrf.mxu2 }
 0x244   :  { %v1798_v9 = vmax.f32 %v1702_v1, 0.0  ;;  %v2883_v47 = vadd.f32 %v1187_v2, %v1098_v0  ;;  %v2889_v48 = vpop.f32.mrf.mxu3  ;;  %v1113_v56 = vpop.f32.mrf.mxu1 }
 0x246   :  { %v2887_v55 = vpack.c.bf16 %v1798_v9, %v1797_v57  ;;  %v1677_v57 = vunpack.c.l.bf16 %v1477_v46  ;;  %v1459_v9 = vperm.slane %v2745_v36, %v2503_v60  ;;  %v1441_v36 = vperm.slane %v2787_v42, %v2503_v60 }
 0x247   :  { %v1432_v46 = vperm.slane %v2799_v3, %v2503_v60  ;;  %v1255_v41 = vpack.c.bf16 %v2883_v47, %v2883_v47  ;;  %v1423_v42 = vperm.slane %v2757_v14, %v2503_v60 }
 0x24b   :  { %v1189_v21 = vpop.f32.mrf.mxu2 }
 0x24c   :  { %v2891_v37 = vpop.f32.mrf.mxu3  ;;  %v1115_v0 = vpop.f32.mrf.mxu1 }
 0x253   :  { %v1192_v10 = vpop.f32.mrf.mxu2 }
 0x254   :  { %v2895_v23 = vpop.f32.mrf.mxu3  ;;  %v1118_v27 = vpop.f32.mrf.mxu1  ;;  %v1193_v15 = vadd.f32 %v1192_v10, %v1103_v43 }
 0x25b   :  { %v1194_v22 = vpop.f32.mrf.mxu2 }
 0x25c   :  { %v2899_v6 = vpop.f32.mrf.mxu3  ;;  %v1195_v54 = vadd.f32 %v1194_v22, %v1105_v52  ;;  %v1120_v40 = vpop.f32.mrf.mxu1  ;;  %v1190_v52 = vadd.f32 %v1189_v21, %v2862_v17  ;;  %v1257_v22 = vpack.c.bf16 %v1193_v15, %v1193_v15 }
 0x25e   :  { %v1258_v30 = vpack.c.bf16 %v1195_v54, %v1195_v54  ;;  %v1641_v54 = vunpack.c.l.bf16 %v1257_v22  ;;  %v1671_v22 = vunpack.c.l.bf16 %v1423_v42 }
 0x263   :  { %v1197_v16 = vpop.f32.mrf.mxu2 }
 0x264   :  { %v2905_v35 = vpop.f32.mrf.mxu3  ;;  %v1198_v39 = vadd.f32 %v1197_v16, %v1108_v7  ;;  %v2915_v7 = vpop.permute.xlu2 %1534 }
 0x266   :  { %v1259_v49 = vpack.c.bf16 %v1198_v39, %v1198_v39  ;;  %v1642_v39 = vunpack.c.l.bf16 %v1258_v30  ;;  %v1672_v30 = vunpack.c.l.bf16 %v1432_v46 }
 0x268   :  { %v1643_v16 = vunpack.c.l.bf16 %v1259_v49  ;;  %v1673_v49 = vunpack.c.l.bf16 %v1441_v36 }
 0x26a   :  { %v1705_v47 = vadd.f32 %v1673_v49, %v1641_v54 }
 0x26b   :  { %v1199_v63 = vpop.f32.mrf.mxu2 }
 0x26c   :  { %v1200_v32 = vadd.f32 %v1199_v63, %v1110_v45  ;;  %v1676_v45 = vunpack.c.l.bf16 %v1468_v50  ;;  %v1490_v3 = vpop.permute.xlu2 %1489 }
 0x26e   :  { %v1260_v29 = vpack.c.bf16 %v1200_v32, %v1200_v32  ;;  %v1256_v32 = vpack.c.bf16 %v1190_v52, %v1190_v52 }
 0x270   :  { %v1644_v43 = vunpack.c.l.bf16 %v1260_v29 }
 0x272   :  { %v1708_v17 = vadd.f32 %v1676_v45, %v1644_v43  ;;  %v1499_v43 = vpop.permute.xlu0 %1498 }
 0x273   :  { %v1202_v61 = vpop.f32.mrf.mxu2  ;;  %v1504_v14 = vperm.slane %v1499_v43, %v2503_v60  ;;  %v1238_v43 = vadd.f32 %v2899_v6, %v2866_v62  ;;  %v1233_v62 = vadd.f32 %v2891_v37, %v2847_v31 }
 0x274   :  { %v1203_v51 = vadd.f32 %v1202_v61, %v1113_v56  ;;  %v1678_v56 = vunpack.c.l.bf16 %v1486_v18  ;;  %v1675_v61 = vunpack.c.l.bf16 %v1459_v9  ;;  %v1804_v9 = vmax.f32 %v1708_v17, 0.0 }
 0x275   :  { %v1275_v6 = vpack.c.bf16 %v1238_v43, %v1238_v43  ;;  %v1273_v31 = vpack.c.bf16 %v1233_v62, %v1233_v62  ;;  %v1558_v62 = vperm.slane %v2903_v19, %v2503_v60  ;;  %v1540_v19 = vperm.slane %v2915_v7, %v2503_v60 }
 0x276   :  { %v1261_v20 = vpack.c.bf16 %v1203_v51, %v1203_v51  ;;  %v1242_v51 = vpop.f32.mrf.mxu3  ;;  %v1707_v50 = vadd.f32 %v1675_v61, %v1643_v16 }
 0x277   :  { %v1243_v49 = vadd.f32 %v1242_v51, %v2885_v53  ;;  %v1621_v53 = vperm.slane %v2813_v28, %v2503_v60  ;;  %v1659_v37 = vunpack.c.l.bf16 %v1275_v6 }
 0x278   :  { %v1645_v1 = vunpack.c.l.bf16 %v1261_v20  ;;  %v1674_v20 = vunpack.c.l.bf16 %v1450_v11  ;;  %v1803_v45 = vmax.f32 %v1707_v50, 0.0  ;;  %v1680_v50 = vunpack.c.l.bf16 %v1504_v14 }
 0x279   :  { %v1693_v28 = vunpack.c.l.bf16 %v1621_v53 }
 0x27b   :  { %v1204_v59 = vpop.f32.mrf.mxu2 }
 0x27c   :  { %v1205_v2 = vadd.f32 %v1204_v59, %v1115_v0  ;;  %v1709_v0 = vadd.f32 %v1677_v57, %v1645_v1  ;;  %v1123_v1 = vpop.f32.mrf.mxu1  ;;  %v1706_v57 = vadd.f32 %v1674_v20, %v1642_v39 }
 0x27e   :  { %v1262_v10 = vpack.c.bf16 %v1205_v2, %v1205_v2  ;;  %v1805_v15 = vmax.f32 %v1709_v0, 0.0  ;;  %v1640_v2 = vunpack.c.l.bf16 %v1256_v32  ;;  %v1802_v16 = vmax.f32 %v1706_v57, 0.0  ;;  %v1244_v61 = vpop.f32.mrf.mxu3 }
 0x27f   :  { %v1829_v0 = vpack.c.bf16 %v1804_v9, %v1803_v45  ;;  %v1801_v32 = vmax.f32 %v1705_v47, 0.0  ;;  %v1245_v54 = vadd.f32 %v1244_v61, %v2889_v48  ;;  %v1630_v48 = vperm.slane %v2777_v24, %v2503_v60 }
 0x280   :  { %v1646_v63 = vunpack.c.l.bf16 %v1262_v10  ;;  %v1639_v10 = vunpack.c.l.bf16 %v1255_v41 }
 0x281   :  { %v1828_v41 = vpack.c.bf16 %v1802_v16, %v1801_v32  ;;  %v1278_v57 = vpack.c.bf16 %v1245_v54, %v1245_v54  ;;  %v1694_v24 = vunpack.c.l.bf16 %v1630_v48  ;;  %v1657_v32 = vunpack.c.l.bf16 %v1273_v31 }
 0x282   :  { %v1710_v21 = vadd.f32 %v1678_v56, %v1646_v63  ;;  %v1704_v56 = vadd.f32 %v1672_v30, %v1640_v2  ;;  %v1703_v36 = vadd.f32 %v1671_v22, %v1639_v10  ;;  %v1277_v10 = vpack.c.bf16 %v1243_v49, %v1243_v49 }
 0x283   :  { %v1207_v29 = vpop.f32.mrf.mxu2  ;;  %v1662_v47 = vunpack.c.l.bf16 %v1278_v57  ;;  %v1603_v22 = vperm.slane %v2789_v13, %v2503_v60 }
 0x284   :  { %v1806_v59 = vmax.f32 %v1710_v21, 0.0  ;;  %v1208_v18 = vadd.f32 %v1207_v29, %v1118_v27  ;;  %v1495_v27 = vperm.slane %v1490_v3, %v2503_v60  ;;  %v1800_v20 = vmax.f32 %v1704_v56, 0.0  ;;  %v2933_v29 = vpop.f32.mrf.mxu1 }
 0x285   :  { %v1661_v45 = vunpack.c.l.bf16 %v1277_v10  ;;  %v1691_v14 = vunpack.c.l.bf16 %v1603_v22 }
 0x286   :  { %v1830_v52 = vpack.c.bf16 %v1806_v59, %v1805_v15  ;;  %v1263_v11 = vpack.c.bf16 %v1208_v18, %v1208_v18  ;;  %v1679_v21 = vunpack.c.l.bf16 %v1495_v27  ;;  %v1799_v15 = vmax.f32 %v1703_v36, 0.0 }
 0x287   :  { %v1726_v27 = vadd.f32 %v1694_v24, %v1662_v47  ;;  %v1725_v16 = vadd.f32 %v1693_v28, %v1661_v45 }
 0x288   :  { %1848 = vmatpush.bf16.msrb.mxu3 %v1830_v52  ;;  %v1647_v39 = vunpack.c.l.bf16 %v1263_v11  ;;  %v1827_v2 = vpack.c.bf16 %v1800_v20, %v1799_v15 }
 0x289   :  { %v1822_v61 = vmax.f32 %v1726_v27, 0.0 }
 0x28a   :  { %v1711_v59 = vadd.f32 %v1679_v21, %v1647_v39  ;;  %v1723_v39 = vadd.f32 %v1691_v14, %v1659_v37 }
 0x28b   :  { %v1209_v63 = vpop.f32.mrf.mxu2 }
 0x28c   :  { %v1210_v17 = vadd.f32 %v1209_v63, %v1120_v40  ;;  %1849 = vmatpush.bf16.msrb.mxu3 %v1829_v0  ;;  %v1240_v40 = vadd.f32 %v2905_v35, %v2881_v4  ;;  %v1807_v52 = vmax.f32 %v1711_v59, 0.0  ;;  %v1235_v4 = vadd.f32 %v2895_v23, %v2852_v8  ;;  %v2955_v11 = vpop.f32.mrf.mxu1 }
 0x28d   :  { %v1585_v0 = vperm.slane %v2809_v58, %v2503_v60  ;;  %v1819_v58 = vmax.f32 %v1723_v39, 0.0 }
 0x28e   :  { %v1264_v46 = vpack.c.bf16 %v1210_v17, %v1210_v17  ;;  %v1276_v35 = vpack.c.bf16 %v1240_v40, %v1240_v40  ;;  %v1274_v8 = vpack.c.bf16 %v1235_v4, %v1235_v4  ;;  %v1821_v17 = vmax.f32 %v1725_v16, 0.0 }
 0x290   :  { %v1648_v18 = vunpack.c.l.bf16 %v1264_v46  ;;  %1850 = vmatpush.bf16.msrb.mxu3 %v1828_v41  ;;  %v1660_v23 = vunpack.c.l.bf16 %v1276_v35  ;;  %v1658_v63 = vunpack.c.l.bf16 %v1274_v8  ;;  %v1567_v35 = vperm.slane %v2897_v44, %v2503_v60 }
 0x292   :  { %v1712_v42 = vadd.f32 %v1680_v50, %v1648_v18  ;;  %v1687_v27 = vunpack.c.l.bf16 %v1567_v35 }
 0x293   :  { %v1212_v9 = vpop.f32.mrf.mxu2 }
 0x294   :  { %v1808_v30 = vmax.f32 %v1712_v42, 0.0  ;;  %v2938_v3 = vadd.f32 %v1212_v9, %v1123_v1  ;;  %1851 = vmatpush.bf16.msrb.mxu3 %v1827_v2  ;;  %v1612_v1 = vperm.slane %v2791_v26, %v2503_v60  ;;  %v1130_v46 = vpop.f32.mrf.mxu1  ;;  %v1571_v9 = vpop.permute.xlu1 %1570 }
 0x295   :  { %v1576_v24 = vperm.slane %v1571_v9, %v2503_v60 }
 0x296   :  { %v2946_v51 = vpack.c.bf16 %v1808_v30, %v1807_v52  ;;  %v1692_v26 = vunpack.c.l.bf16 %v1612_v1 }
 0x297   :  { %v1688_v16 = vunpack.c.l.bf16 %v1576_v24 }
 0x298   :  { %1852 = vmatpush.bf16.msrb.mxu3 %v2887_v55  ;;  %v1594_v55 = vperm.slane %v2893_v12, %v2503_v60  ;;  %v1724_v13 = vadd.f32 %v1692_v26, %v1660_v23  ;;  %v1838_v12 = vpack.c.bf16 %v1822_v61, %v1821_v17  ;;  %v1549_v26 = vperm.slane %v2901_v33, %v2503_v60 }
 0x29a   :  { %v1690_v36 = vunpack.c.l.bf16 %v1594_v55  ;;  %v1820_v20 = vmax.f32 %v1724_v13, 0.0 }
 0x29b   :  { %v2959_v56 = vpop.f32.mrf.mxu2 }
 0x29c   :  { %1853 = vmatpush.bf16.msrb.mxu3 %v2869_v25  ;;  %v1689_v25 = vunpack.c.l.bf16 %v1585_v0  ;;  %v1722_v21 = vadd.f32 %v1690_v36, %v1658_v63  ;;  %v1837_v15 = vpack.c.bf16 %v1820_v20, %v1819_v58  ;;  %v1133_v42 = vpop.f32.mrf.mxu1  ;;  %v1526_v43 = vpop.permute.xlu1 %1525  ;;  %v1215_v44 = vadd.f32 %v2959_v56, %v2933_v29 }
 0x29d   :  { %v1686_v0 = vunpack.c.l.bf16 %v1558_v62  ;;  %v1685_v36 = vunpack.c.l.bf16 %v1549_v26  ;;  %v1684_v56 = vunpack.c.l.bf16 %v1540_v19 }
 0x29e   :  { %v1721_v54 = vadd.f32 %v1689_v25, %v1657_v32  ;;  %v1818_v50 = vmax.f32 %v1722_v21, 0.0  ;;  %v1531_v32 = vperm.slane %v1526_v43, %v2503_v60  ;;  %v1266_v33 = vpack.c.bf16 %v1215_v44, %v1215_v44 }
 0x29f   :  { %v1265_v21 = vpack.c.bf16 %v2938_v3, %v2938_v3 }
 0x2a0   :  { %1854 = vmatpush.bf16.msrb.mxu3 %v2850_v34  ;;  %v1817_v59 = vmax.f32 %v1721_v54, 0.0  ;;  %v1839_v34 = vld [vmem:[%s3001_s5] sm:$0x3]  ;;  %v1513_v54 = vperm.slane %v2917_v5, %v2503_v60  ;;  %v1650_v58 = vunpack.c.l.bf16 %v1266_v33 }
 0x2a1   :  { %1843 = vst [vmem:[#allocation1] ss:$9 sm:$0xff] %v1839_v34 }
 0x2a2   :  { %v1836_v49 = vpack.c.bf16 %v1818_v50, %v1817_v59 }
 0x2a3   :  { %v1217_v41 = vpop.f32.mrf.mxu2 }
 0x2a4   :  { %1855 = vmatpush.bf16.msrb.mxu3 %v2831_v38  ;;  %v1135_v38 = vpop.f32.mrf.mxu1  ;;  %v1218_v28 = vadd.f32 %v1217_v41, %v2955_v11  ;;  %v1517_v14 = vpop.permute.xlu1 %1516  ;;  %v1683_v41 = vunpack.c.l.bf16 %v1531_v32 }
 0x2a5   :  { %v1522_v25 = vperm.slane %v1517_v14, %v2503_v60 }
 0x2a6   :  { %v1267_v11 = vpack.c.bf16 %v1218_v28, %v1218_v28 }
 0x2a7   :  { %v1682_v34 = vunpack.c.l.bf16 %v1522_v25 }
 0x2a8   :  { %1861 = vmatpush.bf16.msra.mxu3 %v1838_v12  ;;  %v1844_v2 = vld [vmem:[#allocation1] sm:$0xff]  ;;  %v1651_v20 = vunpack.c.l.bf16 %v1267_v11  ;;  %v1845_v5 = vld [vmem:[#allocation1 + $0x9] sm:$0xff] }
 0x2a9   :  { %1856 = vmatmul.bf16.vlgmr.msrb.gmra.mxu3 %v1844_v2  ;;  %v1681_v2 = vunpack.c.l.bf16 %v1513_v54 }
 0x2ab   :  { %v1219_v18 = vpop.f32.mrf.mxu2 }
 0x2ac   :  { %1862 = vmatpush.bf16.msra.mxu3 %v1837_v15  ;;  %v1138_v52 = vpop.f32.mrf.mxu1  ;;  %v1220_v47 = vadd.f32 %v1219_v18, %v1130_v46  ;;  %v1649_v18 = vunpack.c.l.bf16 %v1265_v21 }
 0x2ae   :  { %v1268_v55 = vpack.c.bf16 %v1220_v47, %v1220_v47 }
 0x2b0   :  { %1863 = vmatpush.bf16.msra.mxu3 %v1836_v49  ;;  %v1652_v39 = vunpack.c.l.bf16 %v1268_v55  ;;  %v1715_v49 = vadd.f32 %v1683_v41, %v1651_v20 }
 0x2b2   :  { %v1716_v50 = vadd.f32 %v1684_v56, %v1652_v39  ;;  %v1811_v9 = vmax.f32 %v1715_v49, 0.0 }
 0x2b3   :  { %v1222_v40 = vpop.f32.mrf.mxu2 }
 0x2b4   :  { %v1223_v53 = vadd.f32 %v1222_v40, %v1133_v42  ;;  %v1140_v6 = vpop.f32.mrf.mxu1  ;;  %v1714_v40 = vadd.f32 %v1682_v34, %v1650_v58  ;;  %v1812_v3 = vmax.f32 %v1716_v50, 0.0 }
 0x2b6   :  { %v1269_v22 = vpack.c.bf16 %v1223_v53, %v1223_v53  ;;  %v1841_v53 = vstv %s3002_s6 }
 0x2b8   :  { %v1653_v63 = vunpack.c.l.bf16 %v1269_v22 }
 0x2ba   :  { %v1717_v7 = vadd.f32 %v1685_v36, %v1653_v63 }
 0x2bb   :  { %v1224_v57 = vpop.f32.mrf.mxu2 }
 0x2bc   :  { %v1225_v10 = vadd.f32 %v1224_v57, %v1135_v38  ;;  %v1813_v42 = vmax.f32 %v1717_v7, 0.0  ;;  %v1713_v57 = vadd.f32 %v1681_v2, %v1649_v18 }
 0x2be   :  { %v1270_v1 = vpack.c.bf16 %v1225_v10, %v1225_v10 }
 0x2c0   :  { %v1654_v31 = vunpack.c.l.bf16 %v1270_v1 }
 0x2c2   :  { %v1718_v17 = vadd.f32 %v1686_v0, %v1654_v31 }
 0x2c3   :  { %v1227_v30 = vpop.f32.mrf.mxu2 }
 0x2c4   :  { %v1228_v48 = vadd.f32 %v1227_v30, %v1138_v52  ;;  %v1814_v15 = vmax.f32 %v1718_v17, 0.0  ;;  %v1810_v52 = vmax.f32 %v1714_v40, 0.0  ;;  %v1833_v30 = vpack.c.bf16 %v1812_v3, %v1811_v9 }
 0x2c6   :  { %v1271_v4 = vpack.c.bf16 %v1228_v48, %v1228_v48  ;;  %v1834_v38 = vpack.c.bf16 %v1814_v15, %v1813_v42  ;;  %v1809_v48 = vmax.f32 %v1713_v57, 0.0 }
 0x2c8   :  { %v1655_v8 = vunpack.c.l.bf16 %v1271_v4  ;;  %v1832_v60 = vpack.c.bf16 %v1810_v52, %v1809_v48 }
 0x2ca   :  { %v1719_v13 = vadd.f32 %v1687_v27, %v1655_v8 }
 0x2cb   :  { %v1229_v45 = vpop.f32.mrf.mxu2 }
 0x2cc   :  { %v1230_v23 = vadd.f32 %v1229_v45, %v1140_v6  ;;  %v1815_v12 = vmax.f32 %v1719_v13, 0.0 }
 0x2ce   :  { %v1272_v37 = vpack.c.bf16 %v1230_v23, %v1230_v23 }
 0x2d0   :  { %v1656_v61 = vunpack.c.l.bf16 %v1272_v37 }
 0x2d2   :  { %v1720_v29 = vadd.f32 %v1688_v16, %v1656_v61 }
 0x2d4   :  { %v1816_v46 = vmax.f32 %v1720_v29, 0.0 }
 0x2d6   :  { %v1835_v59 = vpack.c.bf16 %v1816_v46, %v1815_v12 }
 0x2d8   :  { %1864 = vmatpush.bf16.msra.mxu3 %v1835_v59 }
 0x2dc   :  { %1865 = vmatpush.bf16.msra.mxu3 %v1834_v38 }
 0x2e0   :  { %1866 = vmatpush.bf16.msra.mxu3 %v1833_v30 }
 0x2e4   :  { %1867 = vmatpush.bf16.msra.mxu3 %v1832_v60 }
 0x2e8   :  { %1868 = vmatpush.bf16.msra.mxu3 %v2946_v51 }
 0x2eb   :  { %1869 = vmatmul.bf16.vlgmr.msra.gmra.mxu3 %v1845_v5 }
 0x32c   :  { %v1857_v43 = vpop.f32.mrf.mxu3 }
 0x32d   :  { %v1858_v4 = vadd.f32 %v1857_v43, %v1841_v53 }
 0x334   :  { %v1859_v10 = vpop.f32.mrf.mxu3 }
 0x36e   :  { %v1870_v35 = vpop.f32.mrf.mxu3 }
 0x36f   :  { %v1871_v47 = vadd.f32 %v1870_v35, %v1858_v4 }
 0x371   :  { %1874 = vst [vmem:[%s3003_s7] sm:$0x1] %v1871_v47 }
 0x376   :  { %v1872_v1 = vpop.f32.mrf.mxu3 }

</bundles_post_ra>
